<compile_context>
chip_gen: v6e
topology: v6e:2x2x1
jax: 0.10.0
libtpu: 0.0.40
codegen_flags: <defaults>
</compile_context>

<pallas_src>
from functools import partial

import jax
import jax.numpy as jnp
from jax.experimental import pallas as pl
from jax.experimental.pallas import tpu as pltpu


# ---------------------------------------------------------------------------
# In-kernel pooling helpers (operate on an NHWC value resident in VMEM).
# ---------------------------------------------------------------------------

def _row_reduce(t, is_max):
    """Reduce axis 1 (a leading, non-layout axis) of t.

    max: plain jnp.max.  sum: accumulate in float32 slice-by-slice so a
    bf16/int8 input is never materialized as a full-tile f32 copy."""
    n = t.shape[1]
    if n == 1:
        r = jnp.squeeze(t, axis=1)
        return r if is_max else r.astype(jnp.float32)
    if is_max:
        return jnp.max(t, axis=1)
    if n <= 16:
        acc = t[:, 0].astype(jnp.float32)
        for j in range(1, n):
            acc = acc + t[:, j].astype(jnp.float32)
        return acc
    return jnp.sum(t, axis=1, dtype=jnp.float32)


def _grid_reduce(v, split, is_max):
    """Pool a (B, H, W, C) value over an exact split x split window grid.

    Requires H % split == 0 and W % split == 0; returns (B, split, split, C)
    (float32 when summing).  Row bands are folded into the leading dim (a
    layout-free reshape) and reduced first; the column reduce then walks
    `split` contiguous sublane bands instead of a lane/sublane-splitting
    reshape (avoids the relayout pass flagged by the perf review)."""
    b, hv, wv, c = v.shape
    sh, sw = hv // split, wv // split
    t = v.reshape(b * split, sh, wv, c)          # split H: pure batch-dim split
    t = _row_reduce(t, is_max)                   # (b*split, W, C)
    cols = []
    for ow in range(split):
        band = t[:, ow * sw:(ow + 1) * sw, :]    # contiguous sublane slice
        if band.shape[1] == 1:
            r = jnp.squeeze(band, axis=1)
        elif is_max:
            r = jnp.max(band, axis=1)
        else:
            r = jnp.sum(band, axis=1)            # already float32
        cols.append(r[:, None, :])
    t = cols[0] if split == 1 else jnp.concatenate(cols, axis=1)
    return t.reshape(b, split, split, c)


def _spp_body(x, o_ref, level_params, pool_type, hierarchical):
    """Pool an NHWC tile x: (B, H, W, C) into o_ref: (B, total_windows, C)."""
    b, H, W, c = x.shape
    is_max = (pool_type == 'max_pool')

    def store(off, n, val):                      # val: (B, n, C)
        o_ref[:, off:off + n, :] = val.astype(o_ref.dtype)

    if hierarchical:
        # Every level tiles the final image exactly: pool the finest level
        # once from x (max -> window max, avg -> window SUM in f32) and derive
        # each coarser level from the previous one with a 2x2 reduce.  avg
        # applies its per-level 1/(sh*sw) only at store time, so both pool
        # types are a single pass over the input tile.
        levels_desc = sorted(level_params, key=lambda p: -p[0])
        cur = None
        for (split, off, _h, _w, _kh, _kw, sh, sw, _e) in levels_desc:
            cur = _grid_reduce(x if cur is None else cur, split, is_max)
            n = split * split
            val = cur if is_max else cur * (1.0 / (sh * sw))
            store(off, n, val.reshape(b, n, c))
        return

    # General path: some level was computed on smaller (pre-padding) dims or
    # has ragged / overlapping windows.
    for (split, off, h_i, w_i, kh, kw, sh, sw, exact) in level_params:
        n = split * split
        xi = x if (h_i == H and w_i == W) else x[:, :h_i, :w_i, :]
        if exact:
            red = _grid_reduce(xi, split, is_max)
            if not is_max:
                red = red * (1.0 / (sh * sw))
            store(off, n, red.reshape(b, n, c))
        else:
            # Ragged (overlapping) windows: only reached for tiny or
            # non-divisible spatial dims, so the unrolled loop stays small.
            # TODO(synk): for deep pyramids (split >= 8) switch to a
            # lax.fori_loop(unroll=True) over a static offset table with
            # direct per-window o_ref stores instead of a full Python unroll.
            cols = []
            for oh in range(split):
                for ow in range(split):
                    p = xi[:, oh * sh:oh * sh + kh, ow * sw:ow * sw + kw, :]
                    if is_max:
                        r = jnp.max(jnp.max(p, axis=1), axis=1)
                    else:
                        r = jnp.sum(jnp.sum(p, axis=1, dtype=jnp.float32), axis=1)
                        r = r * (1.0 / (kh * kw))
                    cols.append(r[:, None, :])
            store(off, n, jnp.concatenate(cols, axis=1))


def _spp_kernel_nchw(x_ref, o_ref, *, level_params, pool_type, hierarchical):
    # x_ref: (B_TILE, C, H, W) block straight from HBM (no wrapper relayout).
    # One in-VMEM transpose puts channels on the lane axis; both pooled dims
    # become batch/sublane dims so all window reduces stay off the lane axis.
    x = jnp.transpose(x_ref[...], (0, 2, 3, 1))
    _spp_body(x, o_ref, level_params, pool_type, hierarchical)


def _spp_kernel_nhwc(x_ref, o_ref, *, level_params, pool_type, hierarchical):
    # Fallback kernel: block is already NHWC (wrapper transposed in HBM).
    _spp_body(x_ref[...], o_ref, level_params, pool_type, hierarchical)


# ---------------------------------------------------------------------------
# Wrapper: per-chip tiling, no batch pad, layout-path selection with fallback.
# ---------------------------------------------------------------------------

def _chip_info():
    """Best-effort (VMEM capacity bytes, TensorCore count); safe defaults."""
    vmem_cap, n_cores = 64 * 1024 * 1024, 1        # v7x-safe defaults
    try:
        info = pltpu.get_tpu_info()
        for name in ("vmem_capacity_bytes", "vmem_bytes", "vmem_size_bytes"):
            v = getattr(info, name, None)
            if v:
                try:
                    vmem_cap = int(v)
                    break
                except Exception:
                    pass
        for name in ("num_cores", "core_count", "num_tensorcores",
                     "tensorcore_count"):
            v = getattr(info, name, None)
            if v:
                try:
                    n_cores = int(v)
                    break
                except Exception:
                    pass
    except Exception:
        pass
    return vmem_cap, n_cores


def _pick_batch_tile(bs, per_image_work_bytes, vmem_cap, n_cores):
    """Largest divisor of bs under the per-block byte budget (no batch pad).

    On multi-TensorCore chips, prefer a divisor that yields a balanced (and
    ideally >= 2*n_cores) step count; single-TC chips keep the biggest block."""
    budget = max(per_image_work_bytes, min(16 * 1024 * 1024, vmem_cap // 10))
    max_imgs = max(1, budget // per_image_work_bytes)
    divisors = [d for d in range(1, bs + 1) if bs % d == 0 and d <= max_imgs]
    if not divisors:
        divisors = [1]
    b_tile = max(divisors)
    if n_cores > 1:
        for min_steps in (2 * n_cores, n_cores):
            good = [d for d in divisors
                    if (bs // d) % n_cores == 0 and (bs // d) >= min_steps]
            if good:
                b_tile = max(good)
                break
    return b_tile


_LAYOUT_PATH = {}   # (orig shape, dtype, levels, pool) -> chosen kernel path


def spp_layer(x, num_levels, pool_type='max_pool'):
    """Pallas SPP layer. x: (bs, c, h, w) NCHW. Returns (bs, total_features)."""
    bs, c, h, w = x.shape
    cache_key = (x.shape, str(x.dtype), num_levels, pool_type)

    # Replicate PyTorch's stateful zero-padding across levels (only fires for
    # tiny spatial dims -> negligible HBM traffic).
    params = []
    offset = 0
    for i in range(num_levels):
        split = 2 ** i
        if h // split == 0:
            x = jnp.pad(x, ((0, 0), (0, 0), (0, split - h), (0, 0)))
            h = split
        if w // split == 0:
            x = jnp.pad(x, ((0, 0), (0, 0), (0, 0), (0, split - w)))
            w = split
        kh, sh = h // split + h % split, h // split
        kw, sw = w // split + w % split, w // split
        params.append([split, offset, h, w, kh, kw, sh, sw])
        offset += split * split
    total_windows = offset
    H, W = h, w                                   # final (possibly padded) dims

    # Per-level exact flag (level tiles its own dims -> vectorized path) and
    # the hierarchical flag (every level tiles the FINAL dims exactly).
    hierarchical = True
    for p in params:
        split, _off, h_i, w_i = p[0], p[1], p[2], p[3]
        exact = (h_i % split == 0) and (w_i % split == 0)
        p.append(exact)
        hierarchical &= exact and (h_i == H) and (w_i == W)
    level_params = tuple(tuple(p) for p in params)

    # --- per-chip tiling / VMEM budget -------------------------------------
    vmem_cap, n_cores = _chip_info()
    itemsize = x.dtype.itemsize
    accum_itemsize = itemsize if pool_type == 'max_pool' else max(itemsize, 4)
    # budget = input block + one in-VMEM working copy (relayout / f32 sums)
    per_image_work = c * H * W * (itemsize + accum_itemsize)
    b_tile = _pick_batch_tile(bs, per_image_work, vmem_cap, n_cores)
    n_steps = bs // b_tile

    in_block_bytes = b_tile * c * H * W * itemsize
    work_bytes = b_tile * c * H * W * accum_itemsize
    out_block_bytes = b_tile * total_windows * c * max(itemsize, 4)
    need = 2 * in_block_bytes + 3 * work_bytes + 2 * out_block_bytes + (8 << 20)
    vmem_limit = int(min(max(32 << 20, need), max(32 << 20, (vmem_cap * 3) // 4)))

    kern_kwargs = dict(level_params=level_params, pool_type=pool_type,
                       hierarchical=hierarchical)
    out_shape = jax.ShapeDtypeStruct((bs, total_windows, c), x.dtype)
    out_spec = pl.BlockSpec((b_tile, total_windows, c), lambda b: (b, 0, 0))
    cparams = pltpu.CompilerParams(dimension_semantics=("parallel",),
                                   vmem_limit_bytes=vmem_limit)

    def run_nchw_fused(xin):
        # NCHW blocks straight from HBM; relayout once per tile in VMEM.
        return pl.pallas_call(
            partial(_spp_kernel_nchw, **kern_kwargs),
            out_shape=out_shape, grid=(n_steps,),
            in_specs=[pl.BlockSpec((b_tile, c, H, W), lambda b: (b, 0, 0, 0))],
            out_specs=out_spec, compiler_params=cparams)(xin)

    def run_pretransposed(xin):
        # Fallback: one extra HBM pass for the NCHW->NHWC relayout.
        return pl.pallas_call(
            partial(_spp_kernel_nhwc, **kern_kwargs),
            out_shape=out_shape, grid=(n_steps,),
            in_specs=[pl.BlockSpec((b_tile, H, W, c), lambda b: (b, 0, 0, 0))],
            out_specs=out_spec, compiler_params=cparams)(
                jnp.transpose(xin, (0, 2, 3, 1)))

    path = _LAYOUT_PATH.get(cache_key)
    if path == 'nchw_fused':
        out = run_nchw_fused(x)
    elif path == 'pretranspose':
        out = run_pretransposed(x)
    else:
        try:
            out = jax.block_until_ready(run_nchw_fused(x))
            _LAYOUT_PATH[cache_key] = 'nchw_fused'
        except Exception:
            _LAYOUT_PATH[cache_key] = 'pretranspose'
            out = run_pretransposed(x)

    # Wrapper-side permutation to torch's channel-major per-level flattening
    # (tiny: total_windows * c values per image -> negligible).
    # TODO(synk): if C < 128 is a real deployment shape, fold windows*C into a
    # single lane-dense output slab instead of keeping C alone on lanes.
    pieces = []
    for (split, off, *_rest) in level_params:
        n = split * split
        blk = out[:, off:off + n, :]
        pieces.append(jnp.transpose(blk, (0, 2, 1)).reshape(bs, c * n))
    return jnp.concatenate(pieces, axis=-1)


# ---------------------------------------------------------------------------
# Plain-JAX reference mirroring the PyTorch forward, plus self-checks.
# ---------------------------------------------------------------------------

def _spp_reference(x, num_levels, pool_type='max_pool'):
    bs, c, h, w = x.shape
    pieces = []
    for i in range(num_levels):
        split = 2 ** i
        if h // split == 0:
            x = jnp.pad(x, ((0, 0), (0, 0), (0, split - h), (0, 0)))
            h = split
        if w // split == 0:
            x = jnp.pad(x, ((0, 0), (0, 0), (0, 0), (0, split - w)))
            w = split
        kh, sh = h // split + h % split, h // split
        kw, sw = w // split + w % split, w // split
        rows = []
        for oh in range(split):
            cols = []
            for ow in range(split):
                patch = x[:, :, oh * sh: oh * sh + kh, ow * sw: ow * sw + kw]
                if pool_type == 'max_pool':
                    cols.append(jnp.max(patch, axis=(2, 3)))
                else:
                    cols.append(jnp.mean(patch, axis=(2, 3)))
            rows.append(jnp.stack(cols, axis=-1))
        lvl = jnp.stack(rows, axis=-2)            # (bs, c, split, split)
        pieces.append(lvl.reshape(bs, -1))
    return jnp.concatenate(pieces, axis=-1)


def _check(x, num_levels, pool_type):
    out = jax.block_until_ready(spp_layer(x, num_levels, pool_type))
    ref = _spp_reference(x, num_levels, pool_type)
    assert out.shape == ref.shape, (out.shape, ref.shape)
    assert jnp.allclose(out, ref, atol=1e-5, rtol=1e-5), \
        f"mismatch {pool_type} {x.shape}"
    return out


if __name__ == "__main__":
    key = jax.random.PRNGKey(0)
    k1, k2, k3 = jax.random.split(key, 3)

    # Main case: exact tiling at every level -> single-pass hierarchical path
    # for both max and avg.
    x = jax.random.normal(k1, (2, 4, 16, 16), dtype=jnp.float32)
    out = _check(x, num_levels=3, pool_type='max_pool')
    assert out.shape == (2, 4 * (1 + 4 + 16)), out.shape
    _check(x, num_levels=3, pool_type='avg_pool')

    # Ragged case: 15x15 -> overlapping windows at levels 1 and 2 (fallback).
    x15 = jax.random.normal(k2, (2, 3, 15, 15), dtype=jnp.float32)
    _check(x15, num_levels=3, pool_type='max_pool')
    _check(x15, num_levels=3, pool_type='avg_pool')

    # Zero-padding case: spatial 2x2 with split up to 4 (torch ZeroPad2d glue);
    # levels use the weak-exact vectorized path via in-kernel slicing.
    x2 = jax.random.normal(k3, (2, 4, 2, 2), dtype=jnp.float32)
    _check(x2, num_levels=3, pool_type='max_pool')
    _check(x2, num_levels=3, pool_type='avg_pool')

    print("KERNEL_OK")
</pallas_src>

<mosaic_0001>
module attributes {stable_mosaic.version = 11 : i64} {
  func.func @_spp_kernel_nchw(%arg0: i32, %arg1: memref<2x4x16x16xf32, #tpu.memory_space<vmem>>, %arg2: memref<2x21x4xf32, #tpu.memory_space<vmem>>) attributes {dimension_semantics = [#tpu.dimension_semantics<parallel>], iteration_bounds = array<i64: 1>, scalar_prefetch = 0 : i64, scratch_operands = 0 : i64, tpu.core_type = #tpu.core_type<tc>, window_params = [{transform_indices = @transform_0, window_bounds = array<i64: 2, 4, 16, 16>}, {transform_indices = @transform_1, window_bounds = array<i64: 2, 21, 4>}]} {
    %c0 = arith.constant 0 : index
    %c0_0 = arith.constant 0 : index
    %c0_1 = arith.constant 0 : index
    %c0_2 = arith.constant 0 : index
    %0 = vector.load %arg1[%c0, %c0_0, %c0_1, %c0_2] : memref<2x4x16x16xf32, #tpu.memory_space<vmem>>, vector<2x4x16x16xf32>
    %1 = tpu.transpose %0, [0, 2, 3, 1] : vector<2x4x16x16xf32> -> vector<2x16x16x4xf32>
    %2 = vector.shape_cast %1 : vector<2x16x16x4xf32> to vector<8x4x16x4xf32>
    %cst = arith.constant dense<0xFF800000> : vector<8x16x4xf32>
    %3 = vector.multi_reduction <maximumf>, %2, %cst [1] : vector<8x4x16x4xf32> to vector<8x16x4xf32>
    %4 = vector.extract_strided_slice %3 {offsets = [0, 0, 0], sizes = [8, 4, 4], strides = [1, 1, 1]} : vector<8x16x4xf32> to vector<8x4x4xf32>
    %cst_3 = arith.constant dense<0xFF800000> : vector<8x4xf32>
    %5 = vector.multi_reduction <maximumf>, %4, %cst_3 [1] : vector<8x4x4xf32> to vector<8x4xf32>
    %6 = vector.shape_cast %5 : vector<8x4xf32> to vector<8x1x4xf32>
    %7 = vector.extract_strided_slice %3 {offsets = [0, 4, 0], sizes = [8, 4, 4], strides = [1, 1, 1]} : vector<8x16x4xf32> to vector<8x4x4xf32>
    %cst_4 = arith.constant dense<0xFF800000> : vector<8x4xf32>
    %8 = vector.multi_reduction <maximumf>, %7, %cst_4 [1] : vector<8x4x4xf32> to vector<8x4xf32>
    %9 = vector.shape_cast %8 : vector<8x4xf32> to vector<8x1x4xf32>
    %10 = vector.extract_strided_slice %3 {offsets = [0, 8, 0], sizes = [8, 4, 4], strides = [1, 1, 1]} : vector<8x16x4xf32> to vector<8x4x4xf32>
    %cst_5 = arith.constant dense<0xFF800000> : vector<8x4xf32>
    %11 = vector.multi_reduction <maximumf>, %10, %cst_5 [1] : vector<8x4x4xf32> to vector<8x4xf32>
    %12 = vector.shape_cast %11 : vector<8x4xf32> to vector<8x1x4xf32>
    %13 = vector.extract_strided_slice %3 {offsets = [0, 12, 0], sizes = [8, 4, 4], strides = [1, 1, 1]} : vector<8x16x4xf32> to vector<8x4x4xf32>
    %cst_6 = arith.constant dense<0xFF800000> : vector<8x4xf32>
    %14 = vector.multi_reduction <maximumf>, %13, %cst_6 [1] : vector<8x4x4xf32> to vector<8x4xf32>
    %15 = vector.shape_cast %14 : vector<8x4xf32> to vector<8x1x4xf32>
    %16 = tpu.concatenate %6, %9, %12, %15 in 1 : vector<8x1x4xf32>, vector<8x1x4xf32>, vector<8x1x4xf32>, vector<8x1x4xf32> -> vector<8x4x4xf32>
    %17 = vector.shape_cast %16 : vector<8x4x4xf32> to vector<2x4x4x4xf32>
    %18 = vector.shape_cast %17 : vector<2x4x4x4xf32> to vector<2x16x4xf32>
    %c0_7 = arith.constant 0 : index
    %c5 = arith.constant 5 : index
    %c0_8 = arith.constant 0 : index
    %19 = vector.load %arg2[%c0_7, %c5, %c0_8] : memref<2x21x4xf32, #tpu.memory_space<vmem>>, vector<2x16x4xf32>
    tpu.vector_store %arg2[%c0_7, %c5, %c0_8], %18 {strides = array<i32>} : memref<2x21x4xf32, #tpu.memory_space<vmem>>, vector<2x16x4xf32>,
    %20 = vector.shape_cast %17 : vector<2x4x4x4xf32> to vector<4x2x4x4xf32>
    %cst_9 = arith.constant dense<0xFF800000> : vector<4x4x4xf32>
    %21 = vector.multi_reduction <maximumf>, %20, %cst_9 [1] : vector<4x2x4x4xf32> to vector<4x4x4xf32>
    %22 = vector.extract_strided_slice %21 {offsets = [0, 0, 0], sizes = [4, 2, 4], strides = [1, 1, 1]} : vector<4x4x4xf32> to vector<4x2x4xf32>
    %cst_10 = arith.constant dense<0xFF800000> : vector<4x4xf32>
    %23 = vector.multi_reduction <maximumf>, %22, %cst_10 [1] : vector<4x2x4xf32> to vector<4x4xf32>
    %24 = vector.shape_cast %23 : vector<4x4xf32> to vector<4x1x4xf32>
    %25 = vector.extract_strided_slice %21 {offsets = [0, 2, 0], sizes = [4, 2, 4], strides = [1, 1, 1]} : vector<4x4x4xf32> to vector<4x2x4xf32>
    %cst_11 = arith.constant dense<0xFF800000> : vector<4x4xf32>
    %26 = vector.multi_reduction <maximumf>, %25, %cst_11 [1] : vector<4x2x4xf32> to vector<4x4xf32>
    %27 = vector.shape_cast %26 : vector<4x4xf32> to vector<4x1x4xf32>
    %28 = tpu.concatenate %24, %27 in 1 : vector<4x1x4xf32>, vector<4x1x4xf32> -> vector<4x2x4xf32>
    %29 = vector.shape_cast %28 : vector<4x2x4xf32> to vector<2x2x2x4xf32>
    %30 = vector.shape_cast %29 : vector<2x2x2x4xf32> to vector<2x4x4xf32>
    %c0_12 = arith.constant 0 : index
    %c1 = arith.constant 1 : index
    %c0_13 = arith.constant 0 : index
    %31 = vector.load %arg2[%c0_12, %c1, %c0_13] : memref<2x21x4xf32, #tpu.memory_space<vmem>>, vector<2x4x4xf32>
    tpu.vector_store %arg2[%c0_12, %c1, %c0_13], %30 {strides = array<i32>} : memref<2x21x4xf32, #tpu.memory_space<vmem>>, vector<2x4x4xf32>,
    %cst_14 = arith.constant dense<0xFF800000> : vector<2x2x4xf32>
    %32 = vector.multi_reduction <maximumf>, %29, %cst_14 [1] : vector<2x2x2x4xf32> to vector<2x2x4xf32>
    %cst_15 = arith.constant dense<0xFF800000> : vector<2x4xf32>
    %33 = vector.multi_reduction <maximumf>, %32, %cst_15 [1] : vector<2x2x4xf32> to vector<2x4xf32>
    %34 = vector.shape_cast %33 : vector<2x4xf32> to vector<2x1x4xf32>
    %35 = vector.shape_cast %34 : vector<2x1x4xf32> to vector<2x1x1x4xf32>
    %36 = vector.shape_cast %35 : vector<2x1x1x4xf32> to vector<2x1x4xf32>
    %c0_16 = arith.constant 0 : index
    %c0_17 = arith.constant 0 : index
    %c0_18 = arith.constant 0 : index
    %37 = vector.load %arg2[%c0_16, %c0_17, %c0_18] : memref<2x21x4xf32, #tpu.memory_space<vmem>>, vector<2x1x4xf32>
    tpu.vector_store %arg2[%c0_16, %c0_17, %c0_18], %36 {strides = array<i32>} : memref<2x21x4xf32, #tpu.memory_space<vmem>>, vector<2x1x4xf32>,
    return
  }
  func.func @transform_0(%arg0: i32) -> (i32, i32, i32, i32) {
    %c0_i32 = arith.constant 0 : i32
    %c0_i32_0 = arith.constant 0 : i32
    %c0_i32_1 = arith.constant 0 : i32
    %c0_i32_2 = arith.constant 0 : i32
    return %arg0, %c0_i32, %c0_i32_0, %c0_i32_1 : i32, i32, i32, i32
  }
  func.func @transform_1(%arg0: i32) -> (i32, i32, i32) {
    %c0_i32 = arith.constant 0 : i32
    %c0_i32_0 = arith.constant 0 : i32
    %c0_i32_1 = arith.constant 0 : i32
    return %arg0, %c0_i32, %c0_i32_0 : i32, i32, i32
  }
}

module attributes {stable_mosaic.version = 11 : i64} {
  func.func @_spp_kernel_nhwc(%arg0: i32, %arg1: memref<2x16x16x4xf32, #tpu.memory_space<vmem>>, %arg2: memref<2x21x4xf32, #tpu.memory_space<vmem>>) attributes {dimension_semantics = [#tpu.dimension_semantics<parallel>], iteration_bounds = array<i64: 1>, scalar_prefetch = 0 : i64, scratch_operands = 0 : i64, tpu.core_type = #tpu.core_type<tc>, window_params = [{transform_indices = @transform_0, window_bounds = array<i64: 2, 16, 16, 4>}, {transform_indices = @transform_1, window_bounds = array<i64: 2, 21, 4>}]} {
    %c0 = arith.constant 0 : index
    %c0_0 = arith.constant 0 : index
    %c0_1 = arith.constant 0 : index
    %c0_2 = arith.constant 0 : index
    %0 = vector.load %arg1[%c0, %c0_0, %c0_1, %c0_2] : memref<2x16x16x4xf32, #tpu.memory_space<vmem>>, vector<2x16x16x4xf32>
    %1 = vector.shape_cast %0 : vector<2x16x16x4xf32> to vector<8x4x16x4xf32>
    %cst = arith.constant dense<0xFF800000> : vector<8x16x4xf32>
    %2 = vector.multi_reduction <maximumf>, %1, %cst [1] : vector<8x4x16x4xf32> to vector<8x16x4xf32>
    %3 = vector.extract_strided_slice %2 {offsets = [0, 0, 0], sizes = [8, 4, 4], strides = [1, 1, 1]} : vector<8x16x4xf32> to vector<8x4x4xf32>
    %cst_3 = arith.constant dense<0xFF800000> : vector<8x4xf32>
    %4 = vector.multi_reduction <maximumf>, %3, %cst_3 [1] : vector<8x4x4xf32> to vector<8x4xf32>
    %5 = vector.shape_cast %4 : vector<8x4xf32> to vector<8x1x4xf32>
    %6 = vector.extract_strided_slice %2 {offsets = [0, 4, 0], sizes = [8, 4, 4], strides = [1, 1, 1]} : vector<8x16x4xf32> to vector<8x4x4xf32>
    %cst_4 = arith.constant dense<0xFF800000> : vector<8x4xf32>
    %7 = vector.multi_reduction <maximumf>, %6, %cst_4 [1] : vector<8x4x4xf32> to vector<8x4xf32>
    %8 = vector.shape_cast %7 : vector<8x4xf32> to vector<8x1x4xf32>
    %9 = vector.extract_strided_slice %2 {offsets = [0, 8, 0], sizes = [8, 4, 4], strides = [1, 1, 1]} : vector<8x16x4xf32> to vector<8x4x4xf32>
    %cst_5 = arith.constant dense<0xFF800000> : vector<8x4xf32>
    %10 = vector.multi_reduction <maximumf>, %9, %cst_5 [1] : vector<8x4x4xf32> to vector<8x4xf32>
    %11 = vector.shape_cast %10 : vector<8x4xf32> to vector<8x1x4xf32>
    %12 = vector.extract_strided_slice %2 {offsets = [0, 12, 0], sizes = [8, 4, 4], strides = [1, 1, 1]} : vector<8x16x4xf32> to vector<8x4x4xf32>
    %cst_6 = arith.constant dense<0xFF800000> : vector<8x4xf32>
    %13 = vector.multi_reduction <maximumf>, %12, %cst_6 [1] : vector<8x4x4xf32> to vector<8x4xf32>
    %14 = vector.shape_cast %13 : vector<8x4xf32> to vector<8x1x4xf32>
    %15 = tpu.concatenate %5, %8, %11, %14 in 1 : vector<8x1x4xf32>, vector<8x1x4xf32>, vector<8x1x4xf32>, vector<8x1x4xf32> -> vector<8x4x4xf32>
    %16 = vector.shape_cast %15 : vector<8x4x4xf32> to vector<2x4x4x4xf32>
    %17 = vector.shape_cast %16 : vector<2x4x4x4xf32> to vector<2x16x4xf32>
    %c0_7 = arith.constant 0 : index
    %c5 = arith.constant 5 : index
    %c0_8 = arith.constant 0 : index
    %18 = vector.load %arg2[%c0_7, %c5, %c0_8] : memref<2x21x4xf32, #tpu.memory_space<vmem>>, vector<2x16x4xf32>
    tpu.vector_store %arg2[%c0_7, %c5, %c0_8], %17 {strides = array<i32>} : memref<2x21x4xf32, #tpu.memory_space<vmem>>, vector<2x16x4xf32>,
    %19 = vector.shape_cast %16 : vector<2x4x4x4xf32> to vector<4x2x4x4xf32>
    %cst_9 = arith.constant dense<0xFF800000> : vector<4x4x4xf32>
    %20 = vector.multi_reduction <maximumf>, %19, %cst_9 [1] : vector<4x2x4x4xf32> to vector<4x4x4xf32>
    %21 = vector.extract_strided_slice %20 {offsets = [0, 0, 0], sizes = [4, 2, 4], strides = [1, 1, 1]} : vector<4x4x4xf32> to vector<4x2x4xf32>
    %cst_10 = arith.constant dense<0xFF800000> : vector<4x4xf32>
    %22 = vector.multi_reduction <maximumf>, %21, %cst_10 [1] : vector<4x2x4xf32> to vector<4x4xf32>
    %23 = vector.shape_cast %22 : vector<4x4xf32> to vector<4x1x4xf32>
    %24 = vector.extract_strided_slice %20 {offsets = [0, 2, 0], sizes = [4, 2, 4], strides = [1, 1, 1]} : vector<4x4x4xf32> to vector<4x2x4xf32>
    %cst_11 = arith.constant dense<0xFF800000> : vector<4x4xf32>
    %25 = vector.multi_reduction <maximumf>, %24, %cst_11 [1] : vector<4x2x4xf32> to vector<4x4xf32>
    %26 = vector.shape_cast %25 : vector<4x4xf32> to vector<4x1x4xf32>
    %27 = tpu.concatenate %23, %26 in 1 : vector<4x1x4xf32>, vector<4x1x4xf32> -> vector<4x2x4xf32>
    %28 = vector.shape_cast %27 : vector<4x2x4xf32> to vector<2x2x2x4xf32>
    %29 = vector.shape_cast %28 : vector<2x2x2x4xf32> to vector<2x4x4xf32>
    %c0_12 = arith.constant 0 : index
    %c1 = arith.constant 1 : index
    %c0_13 = arith.constant 0 : index
    %30 = vector.load %arg2[%c0_12, %c1, %c0_13] : memref<2x21x4xf32, #tpu.memory_space<vmem>>, vector<2x4x4xf32>
    tpu.vector_store %arg2[%c0_12, %c1, %c0_13], %29 {strides = array<i32>} : memref<2x21x4xf32, #tpu.memory_space<vmem>>, vector<2x4x4xf32>,
    %cst_14 = arith.constant dense<0xFF800000> : vector<2x2x4xf32>
    %31 = vector.multi_reduction <maximumf>, %28, %cst_14 [1] : vector<2x2x2x4xf32> to vector<2x2x4xf32>
    %cst_15 = arith.constant dense<0xFF800000> : vector<2x4xf32>
    %32 = vector.multi_reduction <maximumf>, %31, %cst_15 [1] : vector<2x2x4xf32> to vector<2x4xf32>
    %33 = vector.shape_cast %32 : vector<2x4xf32> to vector<2x1x4xf32>
    %34 = vector.shape_cast %33 : vector<2x1x4xf32> to vector<2x1x1x4xf32>
    %35 = vector.shape_cast %34 : vector<2x1x1x4xf32> to vector<2x1x4xf32>
    %c0_16 = arith.constant 0 : index
    %c0_17 = arith.constant 0 : index
    %c0_18 = arith.constant 0 : index
    %36 = vector.load %arg2[%c0_16, %c0_17, %c0_18] : memref<2x21x4xf32, #tpu.memory_space<vmem>>, vector<2x1x4xf32>
    tpu.vector_store %arg2[%c0_16, %c0_17, %c0_18], %35 {strides = array<i32>} : memref<2x21x4xf32, #tpu.memory_space<vmem>>, vector<2x1x4xf32>,
    return
  }
  func.func @transform_0(%arg0: i32) -> (i32, i32, i32, i32) {
    %c0_i32 = arith.constant 0 : i32
    %c0_i32_0 = arith.constant 0 : i32
    %c0_i32_1 = arith.constant 0 : i32
    %c0_i32_2 = arith.constant 0 : i32
    return %arg0, %c0_i32, %c0_i32_0, %c0_i32_1 : i32, i32, i32, i32
  }
  func.func @transform_1(%arg0: i32) -> (i32, i32, i32) {
    %c0_i32 = arith.constant 0 : i32
    %c0_i32_0 = arith.constant 0 : i32
    %c0_i32_1 = arith.constant 0 : i32
    return %arg0, %c0_i32, %c0_i32_0 : i32, i32, i32
  }
}

</mosaic_0001>

<bundles_post_ra>
// kernel: tpu_custom_call.1
= control target key start
LH: loop header
LB: loop body
LE: loop exit
PB: predicated region body
PF: predicated region fallthrough
CT: control target
= control target key end

     0   :  { %6 = vsyncpa [#allocation3], 0  ;;  %s3218_s6 = smov [#allocation2]   ;;  %s3965_s0 = inlined_call_operand.hbm [shape: f32[2,4,16,16], index: 0, kind: input, shape index: {}]   ;;  %s3966_s1 = inlined_call_operand.vmem [shape: f32[2,21,4], index: 1, kind: output, shape index: {}]  }
   0x1   :  { %s12_s7 = sshll.u32 %s3218_s6, 4  ;;  %s13_s7 = int_to_ptr.vmem [resolvable:$true] %s12_s7 }
   0x2   :  { %s3204_s8 = scalar_lea.vmem %s13_s7, 2048  ;;  %p3209_p1 = scmp.lt.s32.totalorder %s13_s7, %s13_s7 }
   0x3   :  { %p3205_p0 = scmp.ne.s32.totalorder %s13_s7, %s3204_s8  ;;  %p3210_p2 = scmp.lt.s32.totalorder %s3204_s8, %s3204_s8 }
   0x5   :  { %p3211_p3 = por %p3210_p2, %p3209_p1 }
   0x7   :  { %p3212_p4 = pnand %p3211_p3, %p3205_p0 }
   0x9   :  { %3215 = shalt.err (!%p3212_p4)
}
   0xa   :  { %s3219_s9 = smov 128   ;;  %s3220_s10 = smov 8  }
   0xb   :  { %18 = dma.hbm_to_vmem [thread:$0]  %s3965_s0, 2048, %s13_s7, [#allocation3], %s3219_s9, %s3219_s9, %s3220_s10  }
   0xc   :  { %3216 = dma.done.wait [#allocation3], 2048  }
   0xd   :  { %3217 = vsyncadd [#allocation3], 4294965248  ;;  %v24_v0 = vld [vmem:[#allocation2 + $0x10] sm:$0xff]  ;;  %v22_v1 = vld [vmem:[#allocation2] sm:$0xff]  ;;  %v3221_v16 = vmov 1983009808   ;;  %v299_v18 = vlaneseq }
   0xe   :  { %70 = vxpose.xlu1.b32.start [1/2] (short) (narrow) %v24_v0, 16  ;;  %38 = vxpose.xlu0.b32.start [1/2] (short) (narrow) %v22_v1, 16  ;;  %v25_v2 = vld [vmem:[#allocation2 + $0x18] sm:$0xff]  ;;  %v23_v3 = vld [vmem:[#allocation2 + $0x8] sm:$0xff]  ;;  %v28_v4 = vld [vmem:[#allocation2 + $0x30] sm:$0xff]  ;;  %v297_v17 = vunpack.c.l.s4 %v3221_v16  ;;  %v3223_v47 = vmov 0.0  }
   0xf   :  { %v26_v5 = vld [vmem:[#allocation2 + $0x20] sm:$0xff]  ;;  %v29_v6 = vld [vmem:[#allocation2 + $0x38] sm:$0xff]  ;;  %v27_v7 = vld [vmem:[#allocation2 + $0x28] sm:$0xff]  ;;  %v300_v22 = vshrl.u32 %v299_v18, 7  ;;  %v3222_v25 = vmov 1934713408  }
  0x10   :  { %v32_v8 = vld [vmem:[#allocation2 + $0x50] sm:$0xff]  ;;  %v30_v9 = vld [vmem:[#allocation2 + $0x40] sm:$0xff]  ;;  %v33_v10 = vld [vmem:[#allocation2 + $0x58] sm:$0xff]  ;;  %v298_v21 = vunpack.c.0.s8 %v297_v17  ;;  %v329_v26 = vunpack.c.l.s4 %v3222_v25  ;;  %vm2678_vm0 = vcmask 31744   ;;  %vm2791_vm1 = vcmask 27648  }
  0x11   :  { %v31_v11 = vld [vmem:[#allocation2 + $0x48] sm:$0xff]  ;;  %v36_v12 = vld [vmem:[#allocation2 + $0x70] sm:$0xff]  ;;  %v34_v13 = vld [vmem:[#allocation2 + $0x60] sm:$0xff]  ;;  %vm2848_vm2 = vcmask 31748   ;;  %vm3017_vm3 = vcmask 1040384   ;;  %vm3026_vm4 = vcmask 1041408  }
  0x12   :  { %71 = vxpose.xlu1.b32.end [2/2] (short) (narrow) %v25_v2, 16  ;;  %39 = vxpose.xlu0.b32.end [2/2] (short) (narrow) %v23_v3, 16  ;;  %v37_v14 = vld [vmem:[#allocation2 + $0x78] sm:$0xff]  ;;  %v35_v15 = vld [vmem:[#allocation2 + $0x68] sm:$0xff]  ;;  %v3241_v27 = vsub.s32 %v298_v21, %v300_v22  ;;  %v330_v30 = vunpack.c.0.s8 %v329_v26  ;;  %vm3035_vm5 = vcmask 1042432   ;;  %vm3076_vm6 = vcmask 25600  }
  0x13   :  { %vm3105_vm7 = vcmask 27650   ;;  %vm3182_vm8 = vcmask 24576  }
  0x14   :  { %v3249_v39 = vsub.s32 %v330_v30, %v300_v22 }
  0x16   :  { %134 = vxpose.xlu1.b32.start [1/2] (short) (narrow) %v28_v4, 16  ;;  %102 = vxpose.xlu0.b32.start [1/2] (short) (narrow) %v26_v5, 16 }
  0x1a   :  { %135 = vxpose.xlu1.b32.end [2/2] (short) (narrow) %v29_v6, 16  ;;  %103 = vxpose.xlu0.b32.end [2/2] (short) (narrow) %v27_v7, 16 }
  0x1e   :  { %198 = vxpose.xlu1.b32.start [1/2] (short) (narrow) %v32_v8, 16  ;;  %166 = vxpose.xlu0.b32.start [1/2] (short) (narrow) %v30_v9, 16 }
  0x22   :  { %199 = vxpose.xlu1.b32.end [2/2] (short) (narrow) %v33_v10, 16  ;;  %167 = vxpose.xlu0.b32.end [2/2] (short) (narrow) %v31_v11, 16 }
  0x26   :  { %262 = vxpose.xlu1.b32.start [1/2] (short) (narrow) %v36_v12, 16  ;;  %230 = vxpose.xlu0.b32.start [1/2] (short) (narrow) %v34_v13, 16 }
  0x2a   :  { %263 = vxpose.xlu1.b32.end [2/2] (short) (narrow) %v37_v14, 16  ;;  %231 = vxpose.xlu0.b32.end [2/2] (short) (narrow) %v35_v15, 16 }
  0x8a   :  { %v86_v19 = vpop.trf.xlu1  ;;  %v54_v20 = vpop.trf.xlu0 }
  0x8e   :  { %v3237_v23 = vpop.trf.xlu1  ;;  %v3239_v24 = vpop.trf.xlu0 }
  0x92   :  { %v150_v28 = vpop.trf.xlu1  ;;  %v118_v29 = vpop.trf.xlu0 }
  0x93   :  { %v310_v31 = vcombine.low %v86_v19, %v150_v28  ;;  %v294_v32 = vcombine.low %v54_v20, %v118_v29  ;;  %v311_v35 = vcombine.high %v86_v19, %v150_v28  ;;  %v295_v36 = vcombine.high %v54_v20, %v118_v29 }
  0x95   :  { %v318_v33 = vrot.slane %v310_v31, %v3241_v27  ;;  %v302_v34 = vrot.slane %v294_v32, %v3241_v27  ;;  %v325_v42 = vrot.slane %v311_v35, %v3241_v27  ;;  %v309_v43 = vrot.slane %v295_v36, %v3241_v27 }
  0x96   :  { %v3245_v37 = vpop.trf.xlu1  ;;  %v3247_v38 = vpop.trf.xlu0 }
  0x97   :  { %v326_v40 = vcombine.low %v302_v34, %v318_v33  ;;  %v327_v41 = vcombine.high %v302_v34, %v318_v33  ;;  %v342_v52 = vcombine.low %v309_v43, %v325_v42  ;;  %v343_v59 = vcombine.high %v309_v43, %v325_v42 }
  0x98   :  { %v378_v12 = vcombine.low %v3237_v23, %v3245_v37  ;;  %v362_v13 = vcombine.low %v3239_v24, %v3247_v38  ;;  %v379_v21 = vcombine.high %v3237_v23, %v3245_v37  ;;  %v363_v22 = vcombine.high %v3239_v24, %v3247_v38 }
  0x99   :  { %v334_v44 = vrot.slane %v326_v40, %v3249_v39  ;;  %v341_v49 = vrot.slane %v327_v41, %v3249_v39  ;;  %v350_v54 = vrot.slane %v342_v52, %v3249_v39  ;;  %v357_v63 = vrot.slane %v343_v59, %v3249_v39 }
  0x9a   :  { %v214_v45 = vpop.trf.xlu1  ;;  %v182_v46 = vpop.trf.xlu0  ;;  %v386_v16 = vrot.slane %v378_v12, %v3241_v27  ;;  %v370_v17 = vrot.slane %v362_v13, %v3241_v27  ;;  %v393_v29 = vrot.slane %v379_v21, %v3241_v27  ;;  %v377_v30 = vrot.slane %v363_v22, %v3241_v27 }
  0x9b   :  { %566 = vxpose.xlu0.b32.start.end [1/1] (short) (narrow) %v334_v44, 16  ;;  %v358_v48 = vcombine.high %v334_v44, %v3223_v47  ;;  %v359_v53 = vcombine.high %v341_v49, %v3223_v47  ;;  %v360_v62 = vcombine.high %v350_v54, %v3223_v47  ;;  %v361_v4 = vcombine.high %v357_v63, %v3223_v47 }
  0x9c   :  { %v394_v20 = vcombine.low %v370_v17, %v386_v16  ;;  %v395_v28 = vcombine.high %v370_v17, %v386_v16  ;;  %v410_v24 = vcombine.low %v377_v30, %v393_v29  ;;  %v411_v38 = vcombine.high %v377_v30, %v393_v29 }
  0x9d   :  { %598 = vxpose.xlu1.b32.start.end [1/1] (short) (narrow) %v358_v48, 16 }
  0x9e   :  { %v3256_v50 = vpop.trf.xlu1  ;;  %v3258_v51 = vpop.trf.xlu0  ;;  %v402_v26 = vrot.slane %v394_v20, %v3249_v39  ;;  %v409_v23 = vrot.slane %v395_v28, %v3249_v39  ;;  %v418_v37 = vrot.slane %v410_v24, %v3249_v39  ;;  %v425_v43 = vrot.slane %v411_v38, %v3249_v39 }
  0xa0   :  { %630 = vxpose.xlu0.b32.start.end [1/1] (short) (narrow) %v341_v49, 16  ;;  %v426_v31 = vcombine.high %v402_v26, %v3223_v47  ;;  %v427_v36 = vcombine.high %v409_v23, %v3223_v47  ;;  %v428_v42 = vcombine.high %v418_v37, %v3223_v47  ;;  %v429_v48 = vcombine.high %v425_v43, %v3223_v47 }
  0xa2   :  { %v278_v55 = vpop.trf.xlu1  ;;  %v246_v56 = vpop.trf.xlu0  ;;  %662 = vxpose.xlu1.b32.start.end [1/1] (short) (narrow) %v359_v53, 16 }
  0xa3   :  { %v446_v57 = vcombine.low %v214_v45, %v278_v55  ;;  %v430_v58 = vcombine.low %v182_v46, %v246_v56  ;;  %v447_v1 = vcombine.high %v214_v45, %v278_v55  ;;  %v431_v2 = vcombine.high %v182_v46, %v246_v56 }
  0xa5   :  { %v454_v60 = vrot.slane %v446_v57, %v3241_v27  ;;  %v438_v61 = vrot.slane %v430_v58, %v3241_v27  ;;  %694 = vxpose.xlu0.b32.start.end [1/1] (short) (narrow) %v350_v54, 16  ;;  %v461_v6 = vrot.slane %v447_v1, %v3241_v27  ;;  %v445_v7 = vrot.slane %v431_v2, %v3241_v27 }
  0xa6   :  { %v279_v32 = vpop.trf.xlu1  ;;  %v247_v33 = vpop.trf.xlu0 }
  0xa7   :  { %726 = vxpose.xlu1.b32.start.end [1/1] (short) (narrow) %v360_v62, 16  ;;  %v462_v0 = vcombine.low %v438_v61, %v454_v60  ;;  %v463_v5 = vcombine.high %v438_v61, %v454_v60  ;;  %v478_v10 = vcombine.low %v445_v7, %v461_v6  ;;  %v479_v15 = vcombine.high %v445_v7, %v461_v6 }
  0xa8   :  { %v514_v34 = vcombine.low %v3256_v50, %v279_v32  ;;  %v498_v35 = vcombine.low %v3258_v51, %v247_v33  ;;  %v515_v45 = vcombine.high %v3256_v50, %v279_v32  ;;  %v499_v46 = vcombine.high %v3258_v51, %v247_v33 }
  0xa9   :  { %v470_v3 = vrot.slane %v462_v0, %v3249_v39  ;;  %v477_v9 = vrot.slane %v463_v5, %v3249_v39  ;;  %v486_v14 = vrot.slane %v478_v10, %v3249_v39  ;;  %v493_v19 = vrot.slane %v479_v15, %v3249_v39 }
  0xaa   :  { %758 = vxpose.xlu0.b32.start.end [1/1] (short) (narrow) %v357_v63, 16  ;;  %v522_v40 = vrot.slane %v514_v34, %v3241_v27  ;;  %v506_v41 = vrot.slane %v498_v35, %v3241_v27  ;;  %v529_v53 = vrot.slane %v515_v45, %v3241_v27  ;;  %v513_v54 = vrot.slane %v499_v46, %v3241_v27 }
  0xab   :  { %v494_v8 = vcombine.high %v470_v3, %v3223_v47  ;;  %v495_v11 = vcombine.high %v477_v9, %v3223_v47  ;;  %v496_v18 = vcombine.high %v486_v14, %v3223_v47  ;;  %v497_v25 = vcombine.high %v493_v19, %v3223_v47 }
  0xac   :  { %790 = vxpose.xlu1.b32.start.end [1/1] (short) (narrow) %v361_v4, 16  ;;  %v530_v44 = vcombine.low %v506_v41, %v522_v40  ;;  %v531_v52 = vcombine.high %v506_v41, %v522_v40  ;;  %v546_v50 = vcombine.low %v513_v54, %v529_v53  ;;  %v547_v58 = vcombine.high %v513_v54, %v529_v53 }
  0xae   :  { %v538_v49 = vrot.slane %v530_v44, %v3249_v39  ;;  %v545_v56 = vrot.slane %v531_v52, %v3249_v39  ;;  %v554_v57 = vrot.slane %v546_v50, %v3249_v39  ;;  %v561_v60 = vrot.slane %v547_v58, %v3249_v39 }
  0xaf   :  { %1078 = vxpose.xlu0.b32.start.end [1/1] (short) (narrow) %v470_v3, 16 }
  0xb0   :  { %v562_v55 = vcombine.high %v538_v49, %v3223_v47  ;;  %v563_v51 = vcombine.high %v545_v56, %v3223_v47  ;;  %v564_v59 = vcombine.high %v554_v57, %v3223_v47  ;;  %v565_v61 = vcombine.high %v561_v60, %v3223_v47 }
  0xb1   :  { %1110 = vxpose.xlu1.b32.start.end [1/1] (short) (narrow) %v494_v8, 16 }
  0xb4   :  { %1142 = vxpose.xlu0.b32.start.end [1/1] (short) (narrow) %v477_v9, 16 }
  0xb6   :  { %1174 = vxpose.xlu1.b32.start.end [1/1] (short) (narrow) %v495_v11, 16 }
  0xb9   :  { %1206 = vxpose.xlu0.b32.start.end [1/1] (short) (narrow) %v486_v14, 16 }
  0xbb   :  { %1238 = vxpose.xlu1.b32.start.end [1/1] (short) (narrow) %v496_v18, 16 }
  0xbe   :  { %1270 = vxpose.xlu0.b32.start.end [1/1] (short) (narrow) %v493_v19, 16 }
  0xc0   :  { %1302 = vxpose.xlu1.b32.start.end [1/1] (short) (narrow) %v497_v25, 16 }
  0xc3   :  { %822 = vxpose.xlu0.b32.start.end [1/1] (short) (narrow) %v402_v26, 16 }
  0xc5   :  { %854 = vxpose.xlu1.b32.start.end [1/1] (short) (narrow) %v426_v31, 16 }
  0xc8   :  { %886 = vxpose.xlu0.b32.start.end [1/1] (short) (narrow) %v409_v23, 16 }
  0xca   :  { %918 = vxpose.xlu1.b32.start.end [1/1] (short) (narrow) %v427_v36, 16 }
  0xcd   :  { %950 = vxpose.xlu0.b32.start.end [1/1] (short) (narrow) %v418_v37, 16 }
  0xcf   :  { %982 = vxpose.xlu1.b32.start.end [1/1] (short) (narrow) %v428_v42, 16 }
  0xd2   :  { %1014 = vxpose.xlu0.b32.start.end [1/1] (short) (narrow) %v425_v43, 16 }
  0xd4   :  { %1046 = vxpose.xlu1.b32.start.end [1/1] (short) (narrow) %v429_v48, 16 }
  0xd7   :  { %1334 = vxpose.xlu0.b32.start.end [1/1] (short) (narrow) %v538_v49, 16 }
  0xd9   :  { %1366 = vxpose.xlu1.b32.start.end [1/1] (short) (narrow) %v562_v55, 16 }
  0xdc   :  { %1398 = vxpose.xlu0.b32.start.end [1/1] (short) (narrow) %v545_v56, 16 }
  0xde   :  { %1430 = vxpose.xlu1.b32.start.end [1/1] (short) (narrow) %v563_v51, 16 }
  0xe1   :  { %1462 = vxpose.xlu0.b32.start.end [1/1] (short) (narrow) %v554_v57, 16 }
  0xe3   :  { %1494 = vxpose.xlu1.b32.start.end [1/1] (short) (narrow) %v564_v59, 16 }
  0xe6   :  { %1526 = vxpose.xlu0.b32.start.end [1/1] (short) (narrow) %v561_v60, 16 }
  0xe8   :  { %1558 = vxpose.xlu1.b32.start.end [1/1] (short) (narrow) %v565_v61, 16 }
 0x117   :  { %v582_v62 = vpop.trf.xlu0 }
 0x119   :  { %v614_v63 = vpop.trf.xlu1 }
 0x11b   :  { %v583_v0 = vpop.trf.xlu0 }
 0x11d   :  { %v615_v1 = vpop.trf.xlu1 }
 0x11f   :  { %v646_v2 = vpop.trf.xlu0 }
 0x120   :  { %v1590_v3 = vcombine.low %v582_v62, %v646_v2  ;;  %v1591_v4 = vcombine.high %v582_v62, %v646_v2 }
 0x121   :  { %v678_v5 = vpop.trf.xlu1 }
 0x122   :  { %v1606_v6 = vcombine.low %v614_v63, %v678_v5  ;;  %v1607_v7 = vcombine.high %v614_v63, %v678_v5  ;;  %v1598_v8 = vrot.slane %v1590_v3, %v3241_v27  ;;  %v1605_v9 = vrot.slane %v1591_v4, %v3241_v27 }
 0x123   :  { %v647_v10 = vpop.trf.xlu0 }
 0x124   :  { %v1614_v11 = vrot.slane %v1606_v6, %v3241_v27  ;;  %v1621_v47 = vrot.slane %v1607_v7, %v3241_v27  ;;  %v1862_v12 = vcombine.low %v583_v0, %v647_v10  ;;  %v1863_v13 = vcombine.high %v583_v0, %v647_v10 }
 0x125   :  { %v679_v14 = vpop.trf.xlu1 }
 0x126   :  { %v1654_v15 = vcombine.low %v1598_v8, %v1614_v11  ;;  %v1655_v16 = vcombine.high %v1598_v8, %v1614_v11  ;;  %v1670_v17 = vcombine.low %v1605_v9, %v1621_v47  ;;  %v1671_v18 = vcombine.high %v1605_v9, %v1621_v47 }
 0x127   :  { %v1878_v19 = vcombine.low %v615_v1, %v679_v14  ;;  %v1879_v20 = vcombine.high %v615_v1, %v679_v14  ;;  %v710_v21 = vpop.trf.xlu0  ;;  %v1870_v22 = vrot.slane %v1862_v12, %v3241_v27  ;;  %v1877_v25 = vrot.slane %v1863_v13, %v3241_v27 }
 0x128   :  { %v1662_v41 = vrot.slane %v1654_v15, %v3249_v39  ;;  %v1669_v52 = vrot.slane %v1655_v16, %v3249_v39  ;;  %v1678_v53 = vrot.slane %v1670_v17, %v3249_v39  ;;  %v1685_v54 = vrot.slane %v1671_v18, %v3249_v39 }
 0x129   :  { %v1886_v26 = vrot.slane %v1878_v19, %v3241_v27  ;;  %v1893_v28 = vrot.slane %v1879_v20, %v3241_v27  ;;  %v742_v29 = vpop.trf.xlu1 }
 0x12b   :  { %v1926_v30 = vcombine.low %v1870_v22, %v1886_v26  ;;  %v1927_v31 = vcombine.high %v1870_v22, %v1886_v26  ;;  %v1942_v32 = vcombine.low %v1877_v25, %v1893_v28  ;;  %v1943_v33 = vcombine.high %v1877_v25, %v1893_v28  ;;  %v711_v23 = vpop.trf.xlu0 }
 0x12d   :  { %v743_v24 = vpop.trf.xlu1  ;;  %v3330_v55 = vrot.slane %v1926_v30, %v3249_v39  ;;  %v3333_v59 = vrot.slane %v1927_v31, %v3249_v39  ;;  %v3336_v60 = vrot.slane %v1942_v32, %v3249_v39  ;;  %v3345_v4 = vrot.slane %v1943_v33, %v3249_v39 }
 0x12f   :  { %v774_v34 = vpop.trf.xlu0 }
 0x130   :  { %v1622_v35 = vcombine.low %v710_v21, %v774_v34  ;;  %v1623_v36 = vcombine.high %v710_v21, %v774_v34 }
 0x131   :  { %v806_v37 = vpop.trf.xlu1 }
 0x132   :  { %v1638_v38 = vcombine.low %v742_v29, %v806_v37  ;;  %v1639_v40 = vcombine.high %v742_v29, %v806_v37  ;;  %v1630_v42 = vrot.slane %v1622_v35, %v3241_v27  ;;  %v1637_v43 = vrot.slane %v1623_v36, %v3241_v27 }
 0x133   :  { %v775_v44 = vpop.trf.xlu0 }
 0x134   :  { %v1646_v45 = vrot.slane %v1638_v38, %v3241_v27  ;;  %v1653_v46 = vrot.slane %v1639_v40, %v3241_v27  ;;  %v1894_v48 = vcombine.low %v711_v23, %v775_v44  ;;  %v1895_v49 = vcombine.high %v711_v23, %v775_v44 }
 0x135   :  { %v807_v56 = vpop.trf.xlu1 }
 0x136   :  { %v1686_v50 = vcombine.low %v1630_v42, %v1646_v45  ;;  %v1687_v51 = vcombine.high %v1630_v42, %v1646_v45  ;;  %v1702_v57 = vcombine.low %v1637_v43, %v1653_v46  ;;  %v1703_v58 = vcombine.high %v1637_v43, %v1653_v46 }
 0x137   :  { %v1910_v61 = vcombine.low %v743_v24, %v807_v56  ;;  %v1911_v62 = vcombine.high %v743_v24, %v807_v56  ;;  %v3338_v63 = vpop.trf.xlu0  ;;  %v1902_v5 = vrot.slane %v1894_v48, %v3241_v27  ;;  %v1909_v20 = vrot.slane %v1895_v49, %v3241_v27 }
 0x138   :  { %v1694_v0 = vrot.slane %v1686_v50, %v3249_v39  ;;  %v1701_v1 = vrot.slane %v1687_v51, %v3249_v39  ;;  %v1710_v2 = vrot.slane %v1702_v57, %v3249_v39  ;;  %v1717_v3 = vrot.slane %v1703_v58, %v3249_v39 }
 0x139   :  { %v1918_v6 = vrot.slane %v1910_v61, %v3241_v27  ;;  %v1925_v7 = vrot.slane %v1911_v62, %v3241_v27  ;;  %v3350_v8 = vpop.trf.xlu1 }
 0x13a   :  { %v1718_v9 = vcombine.low %v1662_v41, %v1694_v0  ;;  %v1719_v10 = vcombine.high %v1662_v41, %v1694_v0  ;;  %v1720_v11 = vcombine.low %v1669_v52, %v1701_v1  ;;  %v1721_v47 = vcombine.high %v1669_v52, %v1701_v1 }
 0x13b   :  { %v1722_v12 = vcombine.low %v1678_v53, %v1710_v2  ;;  %v1723_v13 = vcombine.high %v1678_v53, %v1710_v2  ;;  %v1724_v14 = vcombine.low %v1685_v54, %v1717_v3  ;;  %v1725_v15 = vcombine.high %v1685_v54, %v1717_v3  ;;  %v3352_v16 = vpop.trf.xlu0 }
 0x13c   :  { %v2679_v17 = vsel %vm2678_vm0, %v1718_v9, -inf  ;;  %v2680_v18 = vsel %vm2678_vm0, %v1719_v10, -inf  ;;  %v2682_v19 = vsel %vm2678_vm0, %v1720_v11, -inf  ;;  %v2684_v22 = vsel %vm2678_vm0, %v1721_v47, -inf }
 0x13d   :  { %v2681_v21 = vmax.f32 %v2679_v17, %v2680_v18  ;;  %v2693_v25 = vsel %vm2678_vm0, %v1722_v12, -inf  ;;  %v2694_v26 = vsel %vm2678_vm0, %v1723_v13, -inf  ;;  %v3361_v28 = vpop.trf.xlu1  ;;  %v2696_v30 = vsel %vm2678_vm0, %v1724_v14, -inf }
 0x13e   :  { %v2695_v29 = vmax.f32 %v2693_v25, %v2694_v26  ;;  %v1958_v31 = vcombine.low %v1902_v5, %v1918_v6  ;;  %v1959_v32 = vcombine.high %v1902_v5, %v1918_v6  ;;  %v2698_v23 = vsel %vm2678_vm0, %v1725_v15, -inf }
 0x13f   :  { %v2683_v33 = vmax.f32 %v2681_v21, %v2682_v19  ;;  %v1974_v24 = vcombine.low %v1909_v20, %v1925_v7  ;;  %v1975_v34 = vcombine.high %v1909_v20, %v1925_v7  ;;  %v3365_v35 = vpop.trf.xlu0 }
 0x140   :  { %v2697_v36 = vmax.f32 %v2695_v29, %v2696_v30  ;;  %v1966_v37 = vrot.slane %v1958_v31, %v3249_v39  ;;  %v1973_v38 = vrot.slane %v1959_v32, %v3249_v39  ;;  %v2134_v40 = vcombine.low %v3338_v63, %v3365_v35 }
 0x141   :  { %v2685_v41 = vmax.f32 %v2683_v33, %v2684_v22  ;;  %v1982_v42 = vrot.slane %v1974_v24, %v3249_v39  ;;  %v1989_v43 = vrot.slane %v1975_v34, %v3249_v39  ;;  %v2135_v44 = vcombine.high %v3338_v63, %v3365_v35  ;;  %v3375_v45 = vpop.trf.xlu1 }
 0x142   :  { %v2699_v46 = vmax.f32 %v2697_v36, %v2698_v23  ;;  %v1990_v48 = vcombine.low %v3330_v55, %v1966_v37  ;;  %v1991_v49 = vcombine.high %v3330_v55, %v1966_v37  ;;  %v1992_v52 = vcombine.low %v3333_v59, %v1973_v38 }
 0x143   :  { %v2792_v53 = vsel %vm2791_vm1, %v2685_v41, -inf  ;;  %v2849_v54 = vsel %vm2848_vm2, %v2685_v41, -inf  ;;  %v1993_v56 = vcombine.high %v3333_v59, %v1973_v38  ;;  %v1994_v50 = vcombine.low %v3336_v60, %v1982_v42  ;;  %v3384_v51 = vpop.trf.xlu0 }
 0x144   :  { %v2793_v57 = vrot.slane %v2792_v53, 4  ;;  %v2799_v58 = vsel %vm2791_vm1, %v2699_v46, -inf  ;;  %v2850_v61 = vrot.slane %v2849_v54, 4  ;;  %v2856_v62 = vsel %vm2848_vm2, %v2699_v46, -inf }
 0x145   :  { %v2800_v0 = vrot.slane %v2799_v58, 4  ;;  %v2857_v55 = vrot.slane %v2856_v62, 4  ;;  %v1995_v1 = vcombine.high %v3336_v60, %v1982_v42  ;;  %v1996_v2 = vcombine.low %v3345_v4, %v1989_v43  ;;  %v3390_v3 = vpop.trf.xlu1 }
 0x146   :  { %v2794_v5 = vmax.f32 %v2792_v53, %v2793_v57  ;;  %v2851_v59 = vmax.f32 %v2849_v54, %v2850_v61  ;;  %v1997_v6 = vcombine.high %v3345_v4, %v1989_v43  ;;  %v2707_v7 = vsel %vm2678_vm0, %v1990_v48, -inf }
 0x147   :  { %v2801_v9 = vmax.f32 %v2799_v58, %v2800_v0  ;;  %v2858_v10 = vmax.f32 %v2856_v62, %v2857_v55  ;;  %v2708_v11 = vsel %vm2678_vm0, %v1991_v49, -inf  ;;  %v3395_v47 = vpop.trf.xlu0  ;;  %v2710_v15 = vsel %vm2678_vm0, %v1992_v52, -inf }
 0x148   :  { %v2795_v12 = vrot.slane %v2794_v5, 2  ;;  %v2852_v13 = vrot.slane %v2851_v59, 2  ;;  %v2709_v14 = vmax.f32 %v2707_v7, %v2708_v11  ;;  %v2721_v17 = vsel %vm2678_vm0, %v1994_v50, -inf }
 0x149   :  { %v2802_v60 = vrot.slane %v2801_v9, 2  ;;  %v2722_v18 = vsel %vm2678_vm0, %v1995_v1, -inf  ;;  %v3400_v19 = vpop.trf.xlu1  ;;  %v2859_v4 = vrot.slane %v2858_v10, 2  ;;  %v2712_v26 = vsel %vm2678_vm0, %v1993_v56, -inf }
 0x14a   :  { %v2711_v20 = vmax.f32 %v2709_v14, %v2710_v15  ;;  %v2723_v21 = vmax.f32 %v2721_v17, %v2722_v18  ;;  %v2796_v22 = vmax.f32 %v2794_v5, %v2795_v12  ;;  %v2853_v25 = vmax.f32 %v2851_v59, %v2852_v13 }
 0x14b   :  { %v2724_v29 = vsel %vm2678_vm0, %v1996_v2, -inf  ;;  %v3404_v30 = vpop.trf.xlu0  ;;  %v2803_v31 = vmax.f32 %v2801_v9, %v2802_v60  ;;  %v2726_v23 = vsel %vm2678_vm0, %v1997_v6, -inf  ;;  %v2860_v34 = vmax.f32 %v2858_v10, %v2859_v4 }
 0x14c   :  { %v2713_v32 = vmax.f32 %v2711_v20, %v2712_v26  ;;  %v2725_v33 = vmax.f32 %v2723_v21, %v2724_v29  ;;  %v2797_v38 = vrot.slane %v2796_v22, 1  ;;  %v2854_v41 = vrot.slane %v2853_v25, 1 }
 0x14d   :  { %v3407_v24 = vpop.trf.xlu1  ;;  %v2804_v48 = vrot.slane %v2803_v31, 1  ;;  %v2142_v57 = vrot.slane %v2134_v40, %v3241_v27  ;;  %v2150_v62 = vcombine.low %v3350_v8, %v3375_v45  ;;  %v2151_v0 = vcombine.high %v3350_v8, %v3375_v45 }
 0x14e   :  { %v2727_v36 = vmax.f32 %v2725_v33, %v2726_v23  ;;  %v2806_v37 = vsel %vm2791_vm1, %v2713_v32, -inf  ;;  %v2863_v43 = vsel %vm2848_vm2, %v2713_v32, -inf  ;;  %v2406_v55 = vcombine.low %v3352_v16, %v3384_v51 }
 0x14f   :  { %v2807_v42 = vrot.slane %v2806_v37, 4  ;;  %v1286_v46 = vpop.trf.xlu0  ;;  %v2864_v52 = vrot.slane %v2863_v43, 4  ;;  %v2407_v59 = vcombine.high %v3352_v16, %v3384_v51  ;;  %v2149_v7 = vrot.slane %v2135_v44, %v3241_v27 }
 0x150   :  { %v2813_v49 = vsel %vm2791_vm1, %v2727_v36, -inf  ;;  %v2870_v53 = vsel %vm2848_vm2, %v2727_v36, -inf  ;;  %v2158_v9 = vrot.slane %v2150_v62, %v3241_v27  ;;  %v2165_v8 = vrot.slane %v2151_v0, %v3241_v27 }
 0x151   :  { %v2808_v54 = vmax.f32 %v2806_v37, %v2807_v42  ;;  %v2814_v56 = vrot.slane %v2813_v49, 4  ;;  %v2871_v50 = vrot.slane %v2870_v53, 4  ;;  %v1318_v58 = vpop.trf.xlu1  ;;  %v2865_v61 = vmax.f32 %v2863_v43, %v2864_v52 }
 0x152   :  { %v2861_v45 = vrot.slane %v2860_v34, 1  ;;  %v2198_v12 = vcombine.low %v2142_v57, %v2158_v9  ;;  %v2199_v13 = vcombine.high %v2142_v57, %v2158_v9  ;;  %v2214_v14 = vcombine.low %v2149_v7, %v2165_v8 }
 0x153   :  { %v2809_v1 = vrot.slane %v2808_v54, 2  ;;  %v2815_v2 = vmax.f32 %v2813_v49, %v2814_v56  ;;  %v2872_v5 = vmax.f32 %v2870_v53, %v2871_v50  ;;  %v3425_v6 = vpop.trf.xlu0  ;;  %v2866_v40 = vrot.slane %v2865_v61, 2 }
 0x154   :  { %v2215_v51 = vcombine.high %v2149_v7, %v2165_v8  ;;  %v3439_v63 = vmax.f32 %v2796_v22, %v2797_v38  ;;  %v3441_v35 = vmax.f32 %v2803_v31, %v2804_v48  ;;  %v3443_v44 = vmax.f32 %v2853_v25, %v2854_v41 }
 0x155   :  { %v2810_v10 = vmax.f32 %v2808_v54, %v2809_v1  ;;  %v2816_v11 = vrot.slane %v2815_v2, 2  ;;  %v3433_v60 = vmax.f32 %v2865_v61, %v2866_v40  ;;  %v2873_v16 = vrot.slane %v2872_v5, 2  ;;  %v3435_v15 = vpop.trf.xlu1 }
 0x156   :  { %v3445_v18 = vmax.f32 %v2860_v34, %v2861_v45  ;;  %v2414_v20 = vrot.slane %v2406_v55, %v3241_v27  ;;  %v3449_v21 = vrot.slane %v2407_v59, %v3241_v27  ;;  %v2422_v29 = vcombine.low %v3361_v28, %v3390_v3 }
 0x157   :  { %v3437_v17 = vpop.trf.xlu0  ;;  %v2811_v4 = vrot.slane %v2810_v10, 1  ;;  %v3451_v26 = vmax.f32 %v2815_v2, %v2816_v11  ;;  %v2423_v22 = vcombine.high %v3361_v28, %v3390_v3  ;;  %v2166_v31 = vcombine.low %v3395_v47, %v1286_v46 }
 0x158   :  { %v2868_v25 = vrot.slane %v3433_v60, 1  ;;  %v3459_v32 = vmax.f32 %v2872_v5, %v2873_v16  ;;  %v2167_v33 = vcombine.high %v3395_v47, %v1286_v46  ;;  %v2182_v23 = vcombine.low %v3400_v19, %v1318_v58 }
 0x159   :  { %v2206_v36 = vrot.slane %v2198_v12, %v3249_v39  ;;  %v2213_v37 = vrot.slane %v2199_v13, %v3249_v39  ;;  %v2430_v38 = vrot.slane %v2422_v29, %v3241_v27  ;;  %v3469_v28 = vrot.slane %v2423_v22, %v3241_v27  ;;  %v3475_v43 = vpop.trf.xlu1 }
 0x15a   :  { %v2174_v3 = vrot.slane %v2166_v31, %v3241_v27  ;;  %v2181_v41 = vrot.slane %v2167_v33, %v3241_v27  ;;  %v2183_v42 = vcombine.high %v3400_v19, %v1318_v58  ;;  %v2190_v47 = vrot.slane %v2182_v23, %v3241_v27 }
 0x15b   :  { %v3463_v34 = vpop.trf.xlu0  ;;  %v2470_v46 = vcombine.low %v2414_v20, %v2430_v38  ;;  %v2471_v48 = vcombine.high %v2414_v20, %v2430_v38  ;;  %v2486_v49 = vcombine.low %v3449_v21, %v3469_v28  ;;  %v2487_v52 = vcombine.high %v3449_v21, %v3469_v28 }
 0x15c   :  { %v2197_v53 = vrot.slane %v2183_v42, %v3241_v27  ;;  %v2230_v54 = vcombine.low %v2174_v3, %v2190_v47  ;;  %v2231_v56 = vcombine.high %v2174_v3, %v2190_v47  ;;  %v2438_v50 = vcombine.low %v3404_v30, %v3425_v6 }
 0x15d   :  { %v3486_v57 = vmax.f32 %v2810_v10, %v2811_v4  ;;  %v2818_v58 = vrot.slane %v3451_v26, 1  ;;  %v2222_v61 = vrot.slane %v2214_v14, %v3249_v39  ;;  %v2229_v62 = vrot.slane %v2215_v51, %v3249_v39  ;;  %v3504_v11 = vpop.trf.xlu1 }
 0x15e   :  { %v2238_v0 = vrot.slane %v2230_v54, %v3249_v39  ;;  %v2245_v55 = vrot.slane %v2231_v56, %v3249_v39  ;;  %v2246_v1 = vcombine.low %v2181_v41, %v2197_v53  ;;  %v2247_v2 = vcombine.high %v2181_v41, %v2197_v53 }
 0x15f   :  { %v3484_v19 = vpop.trf.xlu0  ;;  %v3494_v5 = vrot.slane %v2470_v46, %v3249_v39  ;;  %v2439_v59 = vcombine.high %v3404_v30, %v3425_v6  ;;  %v2454_v40 = vcombine.low %v3407_v24, %v3435_v15  ;;  %v2455_v7 = vcombine.high %v3407_v24, %v3435_v15 }
 0x160   :  { %v2254_v9 = vrot.slane %v2246_v1, %v3249_v39  ;;  %v2261_v8 = vrot.slane %v2247_v2, %v3249_v39  ;;  %v2262_v45 = vcombine.low %v2206_v36, %v2238_v0  ;;  %v2263_v10 = vcombine.high %v2206_v36, %v2238_v0 }
 0x161   :  { %v3509_v13 = vrot.slane %v2471_v48, %v3249_v39  ;;  %v2264_v30 = vcombine.low %v2213_v37, %v2245_v55  ;;  %v2265_v6 = vcombine.high %v2213_v37, %v2245_v55  ;;  %v2462_v14 = vrot.slane %v2454_v40, %v3241_v27  ;;  %v3527_v48 = vpop.trf.xlu1 }
 0x162   :  { %v2266_v16 = vcombine.low %v2222_v61, %v2254_v9  ;;  %v2267_v51 = vcombine.high %v2222_v61, %v2254_v9  ;;  %v2268_v24 = vcombine.low %v2229_v62, %v2261_v8  ;;  %v2269_v15 = vcombine.high %v2229_v62, %v2261_v8 }
 0x163   :  { %v3506_v12 = vpop.trf.xlu0  ;;  %v3513_v4 = vrot.slane %v2486_v49, %v3249_v39  ;;  %v2735_v20 = vsel %vm2678_vm0, %v2262_v45, -inf  ;;  %v2736_v21 = vsel %vm2678_vm0, %v2263_v10, -inf  ;;  %v2446_v29 = vrot.slane %v2438_v50, %v3241_v27 }
 0x164   :  { %v2737_v22 = vmax.f32 %v2735_v20, %v2736_v21  ;;  %v2749_v31 = vsel %vm2678_vm0, %v2266_v16, -inf  ;;  %v2750_v33 = vsel %vm2678_vm0, %v2267_v51, -inf  ;;  %v2453_v23 = vrot.slane %v2439_v59, %v3241_v27 }
 0x165   :  { %v2738_v37 = vsel %vm2678_vm0, %v2264_v30, -inf  ;;  %v2751_v38 = vmax.f32 %v2749_v31, %v2750_v33  ;;  %v2469_v28 = vrot.slane %v2455_v7, %v3241_v27  ;;  %v2502_v3 = vcombine.low %v2446_v29, %v2462_v14 }
 0x166   :  { %v2739_v41 = vmax.f32 %v2737_v22, %v2738_v37  ;;  %v2740_v42 = vsel %vm2678_vm0, %v2265_v6, -inf  ;;  %v2752_v47 = vsel %vm2678_vm0, %v2268_v24, -inf  ;;  %v2503_v46 = vcombine.high %v2446_v29, %v2462_v14 }
 0x167   :  { %v3521_v36 = vpop.trf.xlu0  ;;  %v2753_v49 = vmax.f32 %v2751_v38, %v2752_v47  ;;  %v2510_v53 = vrot.slane %v2502_v3, %v3249_v39  ;;  %v2518_v54 = vcombine.low %v2453_v23, %v2469_v28  ;;  %v2519_v56 = vcombine.high %v2453_v23, %v2469_v28 }
 0x168   :  { %v2501_v50 = vrot.slane %v2487_v52, %v3249_v39  ;;  %v2741_v61 = vmax.f32 %v2739_v41, %v2740_v42  ;;  %v2754_v62 = vsel %vm2678_vm0, %v2269_v15, -inf  ;;  %v2517_v0 = vrot.slane %v2503_v46, %v3249_v39  ;;  %v3546_v15 = vpop.trf.xlu1 }
 0x169   :  { %v2755_v1 = vmax.f32 %v2753_v49, %v2754_v62  ;;  %v2526_v2 = vrot.slane %v2518_v54, %v3249_v39  ;;  %v2533_v59 = vrot.slane %v2519_v56, %v3249_v39  ;;  %v2534_v40 = vcombine.low %v3494_v5, %v2510_v53 }
 0x16a   :  { %v2820_v7 = vsel %vm2791_vm1, %v2741_v61, -inf  ;;  %v2877_v9 = vsel %vm2848_vm2, %v2741_v61, -inf  ;;  %v2535_v52 = vcombine.high %v3494_v5, %v2510_v53  ;;  %v2536_v8 = vcombine.low %v3509_v13, %v2517_v0 }
 0x16b   :  { %v3533_v55 = vpop.trf.xlu0  ;;  %v2821_v45 = vrot.slane %v2820_v7, 4  ;;  %v2827_v10 = vsel %vm2791_vm1, %v2755_v1, -inf  ;;  %v2878_v30 = vrot.slane %v2877_v9, 4  ;;  %v2884_v6 = vsel %vm2848_vm2, %v2755_v1, -inf }
 0x16c   :  { %v2828_v14 = vrot.slane %v2827_v10, 4  ;;  %v2885_v16 = vrot.slane %v2884_v6, 4  ;;  %v2537_v51 = vcombine.high %v3509_v13, %v2517_v0  ;;  %v2538_v24 = vcombine.low %v3513_v4, %v2526_v2  ;;  %v3557_v0 = vpop.trf.xlu1 }
 0x16d   :  { %v2822_v20 = vmax.f32 %v2820_v7, %v2821_v45  ;;  %v2879_v21 = vmax.f32 %v2877_v9, %v2878_v30  ;;  %v2539_v5 = vcombine.high %v3513_v4, %v2526_v2  ;;  %v2540_v29 = vcombine.low %v2501_v50, %v2533_v59 }
 0x16e   :  { %v2829_v31 = vmax.f32 %v2827_v10, %v2828_v14  ;;  %v2886_v33 = vmax.f32 %v2884_v6, %v2885_v16  ;;  %v2541_v23 = vcombine.high %v2501_v50, %v2533_v59  ;;  %v2763_v37 = vsel %vm2678_vm0, %v2534_v40, -inf }
 0x16f   :  { %v3549_v22 = vpop.trf.xlu0  ;;  %v2875_v38 = vrot.slane %v3459_v32, 1  ;;  %v2823_v28 = vrot.slane %v2822_v20, 2  ;;  %v2880_v13 = vrot.slane %v2879_v21, 2  ;;  %v2764_v3 = vsel %vm2678_vm0, %v2535_v52, -inf }
 0x170   :  { %v2830_v41 = vrot.slane %v2829_v31, 2  ;;  %v2887_v42 = vrot.slane %v2886_v33, 2  ;;  %v2765_v47 = vmax.f32 %v2763_v37, %v2764_v3  ;;  %v2766_v4 = vsel %vm2678_vm0, %v2536_v8, -inf }
 0x171   :  { %v2824_v46 = vmax.f32 %v2822_v20, %v2823_v28  ;;  %v2881_v49 = vmax.f32 %v2879_v21, %v2880_v13  ;;  %v2777_v53 = vsel %vm2678_vm0, %v2538_v24, -inf  ;;  %v2778_v54 = vsel %vm2678_vm0, %v2539_v5, -inf }
 0x172   :  { %v2831_v56 = vmax.f32 %v2829_v31, %v2830_v41  ;;  %v2888_v50 = vmax.f32 %v2886_v33, %v2887_v42  ;;  %v2767_v61 = vmax.f32 %v2765_v47, %v2766_v4  ;;  %v2779_v62 = vmax.f32 %v2777_v53, %v2778_v54  ;;  %v3584_v31 = vpop.trf.xlu1 }
 0x173   :  { %v2819_v1 = vmax.f32 %v3451_v26, %v2818_v58  ;;  %v2869_v2 = vmax.f32 %v3433_v60, %v2868_v25  ;;  %v2768_v59 = vsel %vm2678_vm0, %v2537_v51, -inf  ;;  %v2780_v40 = vsel %vm2678_vm0, %v2540_v29, -inf  ;;  %v3567_v7 = vpop.trf.xlu0 }
 0x174   :  { %v2876_v9 = vmax.f32 %v3459_v32, %v2875_v38  ;;  %v2769_v52 = vmax.f32 %v2767_v61, %v2768_v59  ;;  %v2781_v8 = vmax.f32 %v2779_v62, %v2780_v40  ;;  %v1726_v45 = vcombine.low %v3437_v17, %v3484_v19 }
 0x175   :  { %v2825_v10 = vrot.slane %v2824_v46, 1  ;;  %v2882_v30 = vrot.slane %v2881_v49, 1  ;;  %v2782_v26 = vsel %vm2678_vm0, %v2541_v23, -inf  ;;  %v1742_v60 = vcombine.low %v3475_v43, %v3527_v48 }
 0x176   :  { %v2832_v25 = vrot.slane %v2831_v56, 1  ;;  %v2889_v58 = vrot.slane %v2888_v50, 1  ;;  %v2783_v6 = vmax.f32 %v2781_v8, %v2782_v26  ;;  %v2834_v14 = vsel %vm2791_vm1, %v2769_v52, -inf }
 0x177   :  { %v2835_v16 = vrot.slane %v2834_v14, 4  ;;  %v2891_v32 = vsel %vm2848_vm2, %v2769_v52, -inf  ;;  %v1743_v51 = vcombine.high %v3475_v43, %v3527_v48  ;;  %v1750_v24 = vrot.slane %v1742_v60, %v3241_v27  ;;  %v3587_v28 = vpop.trf.xlu0 }
 0x178   :  { %v2841_v20 = vsel %vm2791_vm1, %v2783_v6, -inf  ;;  %v2892_v21 = vrot.slane %v2891_v32, 4  ;;  %v2898_v5 = vsel %vm2848_vm2, %v2783_v6, -inf  ;;  %v1727_v29 = vcombine.high %v3437_v17, %v3484_v19 }
 0x179   :  { %v2826_v33 = vmax.f32 %v2824_v46, %v2825_v10  ;;  %v2836_v23 = vmax.f32 %v2834_v14, %v2835_v16  ;;  %v2842_v37 = vrot.slane %v2841_v20, 4  ;;  %v1734_v38 = vrot.slane %v1726_v45, %v3241_v27 }
 0x17a   :  { %v2833_v43 = vmax.f32 %v2831_v56, %v2832_v25  ;;  %v2883_v48 = vmax.f32 %v2881_v49, %v2882_v30  ;;  %v2890_v13 = vmax.f32 %v2888_v50, %v2889_v58  ;;  %v2899_v3 = vrot.slane %v2898_v5, 4  ;;  %v1062_v50 = vpop.trf.xlu1 }
 0x17b   :  { %v3592_v41 = vsel %vm3017_vm3, %v3439_v63, %v3443_v44  ;;  %v2893_v42 = vmax.f32 %v2891_v32, %v2892_v21  ;;  %v1757_v17 = vrot.slane %v1743_v51, %v3241_v27  ;;  %v1790_v19 = vcombine.low %v1734_v38, %v1750_v24  ;;  %v3627_v59 = vpop.trf.xlu0 }
 0x17c   :  { %v3598_v47 = vsel %vm3017_vm3, %v3441_v35, %v3445_v18  ;;  %v3602_v4 = vsel %vm3017_vm3, %v3486_v57, %v2869_v2  ;;  %v2837_v46 = vrot.slane %v2836_v23, 2  ;;  %v1791_v49 = vcombine.high %v1734_v38, %v1750_v24 }
 0x17d   :  { %v3605_v53 = vsel %vm3017_vm3, %v2819_v1, %v2876_v9  ;;  %v3607_v63 = vmax.f32 %v2841_v20, %v2842_v37  ;;  %v1741_v44 = vrot.slane %v1727_v29, %v3241_v27  ;;  %v1998_v54 = vcombine.low %v3463_v34, %v3506_v12 }
 0x17e   :  { %v3613_v56 = vsel %vm3017_vm3, %v2826_v33, %v2883_v48  ;;  %v3616_v35 = vsel %vm3017_vm3, %v2833_v43, %v2890_v13  ;;  %v3618_v18 = vmax.f32 %v2898_v5, %v2899_v3  ;;  %v1999_v57 = vcombine.high %v3463_v34, %v3506_v12  ;;  %v1063_v24 = vpop.trf.xlu1 }
 0x17f   :  { %v2894_v61 = vrot.slane %v2893_v42, 2  ;;  %v3623_v62 = vrot.slane %v1790_v19, %v3249_v39  ;;  %v1806_v1 = vcombine.low %v1741_v44, %v1757_v17  ;;  %v2014_v2 = vcombine.low %v3504_v11, %v3546_v15  ;;  %v3657_v5 = vpop.trf.xlu0 }
 0x180   :  { %v3629_v40 = vmax.f32 %v2836_v23, %v2837_v46  ;;  %v3632_v9 = vrot.slane %v1791_v49, %v3249_v39  ;;  %v1807_v52 = vcombine.high %v1741_v44, %v1757_v17  ;;  %v2015_v34 = vcombine.high %v3504_v11, %v3546_v15 }
 0x181   :  { %v2844_v12 = vrot.slane %v3607_v63, 2  ;;  %v2006_v8 = vrot.slane %v1998_v54, %v3241_v27  ;;  %v2022_v45 = vrot.slane %v2014_v2, %v3241_v27  ;;  %v1758_v10 = vcombine.low %v3521_v36, %v3549_v22 }
 0x182   :  { %v2901_v30 = vrot.slane %v3618_v18, 2  ;;  %v2013_v26 = vrot.slane %v1999_v57, %v3241_v27  ;;  %v2029_v60 = vrot.slane %v2015_v34, %v3241_v27  ;;  %v1759_v25 = vcombine.high %v3521_v36, %v3549_v22 }
 0x183   :  { %v3646_v58 = vmax.f32 %v2893_v42, %v2894_v61  ;;  %v1814_v11 = vrot.slane %v1806_v1, %v3249_v39  ;;  %v2062_v15 = vcombine.low %v2006_v8, %v2022_v45  ;;  %v2063_v6 = vcombine.high %v2006_v8, %v2022_v45  ;;  %v3689_v45 = vpop.trf.xlu1 }
 0x184   :  { %v2839_v14 = vrot.slane %v3629_v40, 1  ;;  %v1821_v16 = vrot.slane %v1807_v52, %v3249_v39  ;;  %v2078_v32 = vcombine.low %v2013_v26, %v2029_v60  ;;  %v2079_v51 = vcombine.high %v2013_v26, %v2029_v60 }
 0x185   :  { %v3652_v20 = vrot.slane %v2062_v15, %v3249_v39  ;;  %v1766_v21 = vrot.slane %v1758_v10, %v3241_v27  ;;  %v1773_v36 = vrot.slane %v1759_v25, %v3241_v27  ;;  %v1774_v22 = vcombine.low %v3557_v0, %v1062_v50 }
 0x186   :  { %v3660_v29 = vrot.slane %v2063_v6, %v3249_v39  ;;  %v3663_v33 = vrot.slane %v2078_v32, %v3249_v39  ;;  %v1775_v23 = vcombine.high %v3557_v0, %v1062_v50  ;;  %v2030_v37 = vcombine.low %v3533_v55, %v3567_v7 }
 0x187   :  { %v1782_v38 = vrot.slane %v1774_v22, %v3241_v27  ;;  %v2031_v43 = vcombine.high %v3533_v55, %v3567_v7  ;;  %v2046_v48 = vcombine.low %v3584_v31, %v1063_v24  ;;  %v2047_v13 = vcombine.high %v3584_v31, %v1063_v24 }
 0x188   :  { %v3674_v3 = vrot.slane %v2079_v51, %v3249_v39  ;;  %v1789_v42 = vrot.slane %v1775_v23, %v3241_v27  ;;  %v2038_v17 = vrot.slane %v2030_v37, %v3241_v27  ;;  %v2270_v0 = vcombine.low %v3587_v28, %v3657_v5 }
 0x189   :  { %v1822_v19 = vcombine.low %v1766_v21, %v1782_v38  ;;  %v1823_v46 = vcombine.high %v1766_v21, %v1782_v38  ;;  %v2054_v49 = vrot.slane %v2046_v48, %v3241_v27  ;;  %v2271_v55 = vcombine.high %v3587_v28, %v3657_v5 }
 0x18a   :  { %v1838_v7 = vcombine.low %v1773_v36, %v1789_v42  ;;  %v1839_v44 = vcombine.high %v1773_v36, %v1789_v42  ;;  %v2045_v31 = vrot.slane %v2031_v43, %v3241_v27  ;;  %v2061_v54 = vrot.slane %v2047_v13, %v3241_v27 }
 0x18b   :  { %v1830_v57 = vrot.slane %v1822_v19, %v3249_v39  ;;  %v1837_v50 = vrot.slane %v1823_v46, %v3249_v39  ;;  %v2094_v61 = vcombine.low %v2038_v17, %v2054_v49  ;;  %v2095_v1 = vcombine.high %v2038_v17, %v2054_v49 }
 0x18c   :  { %v1846_v2 = vrot.slane %v1838_v7, %v3249_v39  ;;  %v1853_v52 = vrot.slane %v1839_v44, %v3249_v39  ;;  %v2110_v34 = vcombine.low %v2045_v31, %v2061_v54  ;;  %v2111_v8 = vcombine.high %v2045_v31, %v2061_v54 }
 0x18d   :  { %v1854_v10 = vcombine.low %v3623_v62, %v1830_v57  ;;  %v1855_v26 = vcombine.high %v3623_v62, %v1830_v57  ;;  %v1856_v60 = vcombine.low %v3632_v9, %v1837_v50  ;;  %v1857_v25 = vcombine.high %v3632_v9, %v1837_v50 }
 0x18e   :  { %v1858_v15 = vcombine.low %v1814_v11, %v1846_v2  ;;  %v1859_v6 = vcombine.high %v1814_v11, %v1846_v2  ;;  %v1860_v32 = vcombine.low %v1821_v16, %v1853_v52  ;;  %v1861_v51 = vcombine.high %v1821_v16, %v1853_v52 }
 0x18f   :  { %v2686_v24 = vsel %vm2678_vm0, %v1854_v10, -inf  ;;  %v2687_v21 = vsel %vm2678_vm0, %v1855_v26, -inf  ;;  %v2689_v36 = vsel %vm2678_vm0, %v1856_v60, -inf  ;;  %v3699_v22 = vrot.slane %v2270_v0, %v3241_v27  ;;  %v3710_v0 = vpop.trf.xlu1 }
 0x190   :  { %v2688_v23 = vmax.f32 %v2686_v24, %v2687_v21  ;;  %v2691_v62 = vsel %vm2678_vm0, %v1857_v25, -inf  ;;  %v2700_v37 = vsel %vm2678_vm0, %v1858_v15, -inf  ;;  %v2701_v9 = vsel %vm2678_vm0, %v1859_v6, -inf }
 0x191   :  { %v2702_v38 = vmax.f32 %v2700_v37, %v2701_v9  ;;  %v2703_v11 = vsel %vm2678_vm0, %v1860_v32, -inf  ;;  %v2102_v16 = vrot.slane %v2094_v61, %v3249_v39  ;;  %v2109_v43 = vrot.slane %v2095_v1, %v3249_v39 }
 0x192   :  { %v2690_v48 = vmax.f32 %v2688_v23, %v2689_v36  ;;  %v2705_v13 = vsel %vm2678_vm0, %v1861_v51, -inf  ;;  %v2118_v42 = vrot.slane %v2110_v34, %v3249_v39  ;;  %v2125_v17 = vrot.slane %v2111_v8, %v3249_v39 }
 0x193   :  { %v2704_v19 = vmax.f32 %v2702_v38, %v2703_v11  ;;  %v2126_v46 = vcombine.low %v3652_v20, %v2102_v16  ;;  %v2127_v49 = vcombine.high %v3652_v20, %v2102_v16  ;;  %v2128_v7 = vcombine.low %v3660_v29, %v2109_v43  ;;  %v3728_v6 = vpop.trf.xlu1 }
 0x194   :  { %v2692_v44 = vmax.f32 %v2690_v48, %v2691_v62  ;;  %v2129_v31 = vcombine.high %v3660_v29, %v2109_v43  ;;  %v2130_v54 = vcombine.low %v3663_v33, %v2118_v42  ;;  %v2131_v57 = vcombine.high %v3663_v33, %v2118_v42 }
 0x195   :  { %v2706_v50 = vmax.f32 %v2704_v19, %v2705_v13  ;;  %v2132_v61 = vcombine.low %v3674_v3, %v2125_v17  ;;  %v2133_v1 = vcombine.high %v3674_v3, %v2125_v17  ;;  %v2714_v2 = vsel %vm2678_vm0, %v2126_v46, -inf }
 0x196   :  { %v2905_v52 = vsel %vm2791_vm1, %v2692_v44, -inf  ;;  %v2961_v20 = vsel %vm2848_vm2, %v2692_v44, -inf  ;;  %v2715_v34 = vsel %vm2678_vm0, %v2127_v49, -inf  ;;  %v2717_v8 = vsel %vm2678_vm0, %v2128_v7, -inf }
 0x197   :  { %v2906_v29 = vrot.slane %v2905_v52, 4  ;;  %v2912_v10 = vsel %vm2791_vm1, %v2706_v50, -inf  ;;  %v2962_v26 = vrot.slane %v2961_v20, 4  ;;  %v2968_v33 = vsel %vm2848_vm2, %v2706_v50, -inf  ;;  %v3741_v50 = vpop.trf.xlu1 }
 0x198   :  { %v2913_v60 = vrot.slane %v2912_v10, 4  ;;  %v2969_v25 = vrot.slane %v2968_v33, 4  ;;  %v2716_v3 = vmax.f32 %v2714_v2, %v2715_v34  ;;  %v2719_v15 = vsel %vm2678_vm0, %v2129_v31, -inf }
 0x199   :  { %v2907_v32 = vmax.f32 %v2905_v52, %v2906_v29  ;;  %v2963_v51 = vmax.f32 %v2961_v20, %v2962_v26  ;;  %v2728_v24 = vsel %vm2678_vm0, %v2130_v54, -inf  ;;  %v2729_v21 = vsel %vm2678_vm0, %v2131_v57, -inf  ;;  %v3739_v57 = vpop.trf.xlu0 }
 0x19a   :  { %v2914_v36 = vmax.f32 %v2912_v10, %v2913_v60  ;;  %v2970_v23 = vmax.f32 %v2968_v33, %v2969_v25  ;;  %v2718_v62 = vmax.f32 %v2716_v3, %v2717_v8  ;;  %v2730_v37 = vmax.f32 %v2728_v24, %v2729_v21 }
 0x19b   :  { %v2908_v9 = vrot.slane %v2907_v32, 2  ;;  %v2964_v38 = vrot.slane %v2963_v51, 2  ;;  %v2731_v11 = vsel %vm2678_vm0, %v2132_v61, -inf  ;;  %v2733_v16 = vsel %vm2678_vm0, %v2133_v1, -inf }
 0x19c   :  { %v2915_v43 = vrot.slane %v2914_v36, 2  ;;  %v2971_v48 = vrot.slane %v2970_v23, 2  ;;  %v2720_v13 = vmax.f32 %v2718_v62, %v2719_v15  ;;  %v2732_v42 = vmax.f32 %v2730_v37, %v2731_v11 }
 0x19d   :  { %v2909_v17 = vmax.f32 %v2907_v32, %v2908_v9  ;;  %v2965_v19 = vmax.f32 %v2963_v51, %v2964_v38  ;;  %v2286_v46 = vcombine.low %v3689_v45, %v3728_v6  ;;  %v2287_v49 = vcombine.high %v3689_v45, %v3728_v6  ;;  %v3752_v37 = vpop.trf.xlu0  ;;  %v3754_v9 = vpop.trf.xlu1 }
 0x19e   :  { %v2916_v7 = vmax.f32 %v2914_v36, %v2915_v43  ;;  %v2972_v44 = vmax.f32 %v2970_v23, %v2971_v48  ;;  %v2734_v31 = vmax.f32 %v2732_v42, %v2733_v16  ;;  %v2919_v54 = vsel %vm2791_vm1, %v2720_v13, -inf }
 0x19f   :  { %v2910_v61 = vrot.slane %v2909_v17, 1  ;;  %v2966_v1 = vrot.slane %v2965_v19, 1  ;;  %v2920_v2 = vrot.slane %v2919_v54, 4  ;;  %v2975_v52 = vsel %vm2848_vm2, %v2720_v13, -inf }
 0x1a0   :  { %v2917_v20 = vrot.slane %v2916_v7, 1  ;;  %v2973_v34 = vrot.slane %v2972_v44, 1  ;;  %v2926_v45 = vsel %vm2791_vm1, %v2734_v31, -inf  ;;  %v2976_v8 = vrot.slane %v2975_v52, 4 }
 0x1a1   :  { %v2911_v29 = vmax.f32 %v2909_v17, %v2910_v61  ;;  %v2967_v10 = vmax.f32 %v2965_v19, %v2966_v1  ;;  %v2921_v26 = vmax.f32 %v2919_v54, %v2920_v2  ;;  %v2927_v33 = vrot.slane %v2926_v45, 4 }
 0x1a2   :  { %v2918_v60 = vmax.f32 %v2916_v7, %v2917_v20  ;;  %v2974_v25 = vmax.f32 %v2972_v44, %v2973_v34  ;;  %v2977_v3 = vmax.f32 %v2975_v52, %v2976_v8  ;;  %v2982_v15 = vsel %vm2848_vm2, %v2734_v31, -inf  ;;  %v3770_v8 = vpop.trf.xlu0 }
 0x1a3   :  { %v3027_v6 = vsel %vm3026_vm4, %v3592_v41, %v2911_v29  ;;  %v2922_v32 = vrot.slane %v2921_v26, 2  ;;  %v2928_v51 = vmax.f32 %v2926_v45, %v2927_v33  ;;  %v2983_v24 = vrot.slane %v2982_v15, 4  ;;  %v3772_v29 = vpop.trf.xlu1 }
 0x1a4   :  { %v3028_v21 = vsel %vm3026_vm4, %v3598_v47, %v2918_v60  ;;  %v3036_v36 = vsel %vm3035_vm5, %v3027_v6, %v2967_v10  ;;  %v2978_v23 = vrot.slane %v2977_v3, 2  ;;  %v2294_v62 = vrot.slane %v2286_v46, %v3241_v27 }
 0x1a5   :  { %v3037_v38 = vsel %vm3035_vm5, %v3028_v21, %v2974_v25  ;;  %v3064_v11 = vsel %vm2791_vm1, %v3036_v36, -inf  ;;  %v2923_v41 = vmax.f32 %v2921_v26, %v2922_v32  ;;  %v2929_v16 = vrot.slane %v2928_v51, 2 }
 0x1a6   :  { %v3052_v43 = vcombine.low %v3036_v36, %v3037_v38  ;;  %v3065_v48 = vsel %vm2791_vm1, %v3037_v38, -inf  ;;  %v2979_v13 = vmax.f32 %v2977_v3, %v2978_v23  ;;  %v2984_v47 = vmax.f32 %v2982_v15, %v2983_v24 }
 0x1a7   :  { %v3066_v42 = vmax.f32 %v3064_v11, %v3065_v48  ;;  %v2924_v17 = vrot.slane %v2923_v41, 1  ;;  %v2930_v19 = vmax.f32 %v2928_v51, %v2929_v16  ;;  %v3760_v46 = vrot.slane %v2287_v49, %v3241_v27  ;;  %v1542_v11 = vpop.trf.xlu0 }
 0x1a8   :  { %3060 = vst.msk [vmem:[%s3966_s1 + $0x5] sm:$0xff] %vm2678_vm0, %v3052_v43  ;;  %v2980_v7 = vrot.slane %v2979_v13, 1  ;;  %v2985_v44 = vrot.slane %v2984_v47, 2  ;;  %v2334_v31 = vcombine.low %v3699_v22, %v2294_v62  ;;  %v2335_v54 = vcombine.high %v3699_v22, %v2294_v62 }
 0x1a9   :  { %v3077_v61 = vsel %vm3076_vm6, %v3066_v42, -inf  ;;  %v3106_v1 = vsel %vm3105_vm7, %v3066_v42, -inf  ;;  %v2925_v2 = vmax.f32 %v2923_v41, %v2924_v17  ;;  %v2931_v52 = vrot.slane %v2930_v19, 1  ;;  %v1574_v41 = vpop.trf.xlu1 }
 0x1aa   :  { %v3078_v20 = vrot.slane %v3077_v61, 4  ;;  %v3107_v49 = vrot.slane %v3106_v1, 4  ;;  %v2981_v34 = vmax.f32 %v2979_v13, %v2980_v7  ;;  %v2986_v45 = vmax.f32 %v2984_v47, %v2985_v44 }
 0x1ab   :  { %v3777_v10 = vmax.f32 %v3607_v63, %v2844_v12  ;;  %v2932_v22 = vmax.f32 %v2930_v19, %v2931_v52  ;;  %v3029_v26 = vsel %vm3026_vm4, %v3602_v4, %v2925_v2  ;;  %v2285_v33 = vrot.slane %v2271_v55, %v3241_v27 }
 0x1ac   :  { %v3079_v60 = vmax.f32 %v3077_v61, %v3078_v20  ;;  %v3108_v25 = vmax.f32 %v3106_v1, %v3107_v49  ;;  %v2987_v3 = vrot.slane %v2986_v45, 1  ;;  %v3038_v15 = vsel %vm3035_vm5, %v3029_v26, %v2981_v34 }
 0x1ad   :  { %v3030_v6 = vsel %vm3026_vm4, %v3605_v53, %v2932_v22  ;;  %v3789_v63 = vrot.slane %v2334_v31, %v3249_v39  ;;  %v3792_v12 = vrot.slane %v2335_v54, %v3249_v39  ;;  %v2350_v4 = vcombine.low %v2285_v33, %v3760_v46 }
 0x1ae   :  { %v3080_v32 = vrot.slane %v3079_v60, 2  ;;  %v3109_v51 = vrot.slane %v3108_v25, 2  ;;  %v2988_v28 = vmax.f32 %v2986_v45, %v2987_v3  ;;  %v2542_v5 = vcombine.low %v3627_v59, %v3739_v57 }
 0x1af   :  { %v3067_v55 = vsel %vm2791_vm1, %v3038_v15, -inf  ;;  %v2351_v24 = vcombine.high %v2285_v33, %v3760_v46  ;;  %v2543_v53 = vcombine.high %v3627_v59, %v3739_v57  ;;  %v2558_v21 = vcombine.low %v3710_v0, %v3741_v50 }
 0x1b0   :  { %v3081_v36 = vmax.f32 %v3079_v60, %v3080_v32  ;;  %v3110_v23 = vmax.f32 %v3108_v25, %v3109_v51  ;;  %v3039_v62 = vsel %vm3035_vm5, %v3030_v6, %v2988_v28  ;;  %v3805_v38 = vrot.slane %v2350_v4, %v3249_v39  ;;  %v1543_v60 = vpop.trf.xlu0  ;;  %v1575_v25 = vpop.trf.xlu1 }
 0x1b1   :  { %v3053_v16 = vcombine.low %v3038_v15, %v3039_v62  ;;  %v3068_v43 = vsel %vm2791_vm1, %v3039_v62, -inf  ;;  %v2550_v48 = vrot.slane %v2542_v5, %v3241_v27  ;;  %v2559_v59 = vcombine.high %v3710_v0, %v3741_v50 }
 0x1b2   :  { %v3082_v57 = vrot.slane %v3081_v36, 1  ;;  %v3111_v13 = vrot.slane %v3110_v23, 1  ;;  %v3069_v47 = vmax.f32 %v3067_v55, %v3068_v43  ;;  %v2566_v42 = vrot.slane %v2558_v21, %v3241_v27 }
 0x1b3   :  { %3061 = vst.msk [vmem:[%s3966_s1 + $0xd] sm:$0xff] %vm2678_vm0, %v3053_v16  ;;  %v2557_v17 = vrot.slane %v2543_v53, %v3241_v27  ;;  %v2573_v19 = vrot.slane %v2559_v59, %v3241_v27  ;;  %v2302_v46 = vcombine.low %v3752_v37, %v1542_v11  ;;  %v2318_v7 = vcombine.low %v3754_v9, %v1574_v41 }
 0x1b4   :  { %v3083_v44 = vmax.f32 %v3081_v36, %v3082_v57  ;;  %v3112_v0 = vmax.f32 %v3110_v23, %v3111_v13  ;;  %v3084_v50 = vsel %vm3076_vm6, %v3069_v47, -inf  ;;  %v3113_v31 = vsel %vm3105_vm7, %v3069_v47, -inf }
 0x1b5   :  { %v3085_v54 = vrot.slane %v3084_v50, 4  ;;  %v3114_v61 = vrot.slane %v3113_v31, 4  ;;  %v2606_v1 = vcombine.low %v2550_v48, %v2566_v42  ;;  %v2607_v2 = vcombine.high %v2550_v48, %v2566_v42 }
 0x1b6   :  { %v3134_v52 = vsel %vm3017_vm3, %v3083_v44, %v3112_v0  ;;  %v3824_v20 = vrot.slane %v2351_v24, %v3249_v39  ;;  %v2622_v49 = vcombine.low %v2557_v17, %v2573_v19  ;;  %v2303_v34 = vcombine.high %v3752_v37, %v1542_v11 }
 0x1b7   :  { %v3086_v45 = vmax.f32 %v3084_v50, %v3085_v54  ;;  %v3115_v22 = vmax.f32 %v3113_v31, %v3114_v61  ;;  %v2623_v26 = vcombine.high %v2557_v17, %v2573_v19  ;;  %v2310_v33 = vrot.slane %v2302_v46, %v3241_v27 }
 0x1b8   :  { %v3162_v3 = vsel %vm3076_vm6, %v3134_v52, -inf  ;;  %v3830_v15 = vrot.slane %v2606_v1, %v3249_v39  ;;  %v3833_v6 = vrot.slane %v2607_v2, %v3249_v39  ;;  %v3836_v4 = vrot.slane %v2622_v49, %v3249_v39 }
 0x1b9   :  { %v3087_v32 = vrot.slane %v3086_v45, 2  ;;  %v3116_v37 = vrot.slane %v3115_v22, 2  ;;  %v2319_v51 = vcombine.high %v3754_v9, %v1574_v41  ;;  %v2326_v28 = vrot.slane %v2318_v7, %v3241_v27 }
 0x1ba   :  { %v2317_v5 = vrot.slane %v2303_v34, %v3241_v27  ;;  %v2574_v55 = vcombine.low %v3770_v8, %v1543_v60  ;;  %v2575_v24 = vcombine.high %v3770_v8, %v1543_v60  ;;  %v2590_v53 = vcombine.low %v3772_v29, %v1575_v25 }
 0x1bb   :  { %v3088_v21 = vmax.f32 %v3086_v45, %v3087_v32  ;;  %v3117_v36 = vmax.f32 %v3115_v22, %v3116_v37  ;;  %v2333_v23 = vrot.slane %v2319_v51, %v3241_v27  ;;  %v2366_v62 = vcombine.low %v2310_v33, %v2326_v28 }
 0x1bc   :  { %v3846_v11 = vrot.slane %v2623_v26, %v3249_v39  ;;  %v2367_v16 = vcombine.high %v2310_v33, %v2326_v28  ;;  %v2582_v9 = vrot.slane %v2574_v55, %v3241_v27  ;;  %v2591_v41 = vcombine.high %v3772_v29, %v1575_v25 }
 0x1bd   :  { %v3089_v43 = vrot.slane %v3088_v21, 1  ;;  %v3118_v48 = vrot.slane %v3117_v36, 1  ;;  %v2374_v59 = vrot.slane %v2366_v62, %v3249_v39  ;;  %v2382_v8 = vcombine.low %v2317_v5, %v2333_v23 }
 0x1be   :  { %v2381_v57 = vrot.slane %v2367_v16, %v3249_v39  ;;  %v2383_v13 = vcombine.high %v2317_v5, %v2333_v23  ;;  %v2589_v47 = vrot.slane %v2575_v24, %v3241_v27  ;;  %v2598_v42 = vrot.slane %v2590_v53, %v3241_v27 }
 0x1bf   :  { %v3090_v17 = vmax.f32 %v3088_v21, %v3089_v43  ;;  %v3119_v19 = vmax.f32 %v3117_v36, %v3118_v48  ;;  %v2390_v46 = vrot.slane %v2382_v8, %v3249_v39  ;;  %v2398_v7 = vcombine.low %v3789_v63, %v2374_v59 }
 0x1c0   :  { %v2397_v29 = vrot.slane %v2383_v13, %v3249_v39  ;;  %v2399_v44 = vcombine.high %v3789_v63, %v2374_v59  ;;  %v2400_v0 = vcombine.low %v3792_v12, %v2381_v57  ;;  %v2605_v50 = vrot.slane %v2591_v41, %v3241_v27 }
 0x1c1   :  { %v3135_v31 = vsel %vm3017_vm3, %v3090_v17, %v3119_v19  ;;  %v2402_v54 = vcombine.low %v3805_v38, %v2390_v46  ;;  %v2403_v61 = vcombine.high %v3805_v38, %v2390_v46  ;;  %v2742_v1 = vsel %vm2678_vm0, %v2398_v7, -inf }
 0x1c2   :  { %v3142_v2 = vcombine.low %v3134_v52, %v3135_v31  ;;  %v3163_v49 = vsel %vm3076_vm6, %v3135_v31, -inf  ;;  %v2404_v34 = vcombine.low %v3824_v20, %v2397_v29  ;;  %v2638_v45 = vcombine.low %v2582_v9, %v2598_v42 }
 0x1c3   :  { %v3164_v22 = vmax.f32 %v3162_v3, %v3163_v49  ;;  %v2401_v63 = vcombine.high %v3792_v12, %v2381_v57  ;;  %v2405_v26 = vcombine.high %v3824_v20, %v2397_v29  ;;  %v2743_v33 = vsel %vm2678_vm0, %v2399_v44, -inf }
 0x1c4   :  { %v3149_v60 = vrot.slane %v3142_v2, %v3241_v27  ;;  %v2744_v25 = vmax.f32 %v2742_v1, %v2743_v33  ;;  %v2756_v38 = vsel %vm2678_vm0, %v2402_v54, -inf  ;;  %v2757_v32 = vsel %vm2678_vm0, %v2403_v61, -inf }
 0x1c5   :  { %v3168_v52 = vsel %vm3076_vm6, %v3164_v22, -inf  ;;  %v2745_v37 = vsel %vm2678_vm0, %v2400_v0, -inf  ;;  %v2758_v51 = vmax.f32 %v2756_v38, %v2757_v32  ;;  %v2759_v3 = vsel %vm2678_vm0, %v2404_v34, -inf }
 0x1c6   :  { %3160 = vst.msk [vmem:[%s3966_s1 + $0x1] sm:$0xf] %vm2791_vm1, %v3149_v60  ;;  %v3169_v12 = vrot.slane %v3168_v52, 4  ;;  %v2746_v20 = vmax.f32 %v2744_v25, %v2745_v37  ;;  %v2639_v28 = vcombine.high %v2582_v9, %v2598_v42  ;;  %v2646_v5 = vrot.slane %v2638_v45, %v3249_v39 }
 0x1c7   :  { %v2747_v55 = vsel %vm2678_vm0, %v2401_v63, -inf  ;;  %v2760_v24 = vmax.f32 %v2758_v51, %v2759_v3  ;;  %v2654_v53 = vcombine.low %v2589_v47, %v2605_v50  ;;  %v2655_v21 = vcombine.high %v2589_v47, %v2605_v50 }
 0x1c8   :  { %v3170_v36 = vmax.f32 %v3168_v52, %v3169_v12  ;;  %v2748_v23 = vmax.f32 %v2746_v20, %v2747_v55  ;;  %v2761_v62 = vsel %vm2678_vm0, %v2405_v26, -inf  ;;  %v2653_v16 = vrot.slane %v2639_v28, %v3249_v39 }
 0x1c9   :  { %v2762_v41 = vmax.f32 %v2760_v24, %v2761_v62  ;;  %v2662_v43 = vrot.slane %v2654_v53, %v3249_v39  ;;  %v2669_v48 = vrot.slane %v2655_v21, %v3249_v39  ;;  %v2670_v9 = vcombine.low %v3830_v15, %v2646_v5 }
 0x1ca   :  { %v3171_v59 = vrot.slane %v3170_v36, 2  ;;  %v2933_v8 = vsel %vm2791_vm1, %v2748_v23, -inf  ;;  %v2989_v57 = vsel %vm2848_vm2, %v2748_v23, -inf  ;;  %v2671_v13 = vcombine.high %v3830_v15, %v2646_v5 }
 0x1cb   :  { %v2934_v47 = vrot.slane %v2933_v8, 4  ;;  %v2940_v42 = vsel %vm2791_vm1, %v2762_v41, -inf  ;;  %v2990_v17 = vrot.slane %v2989_v57, 4  ;;  %v2996_v19 = vsel %vm2848_vm2, %v2762_v41, -inf }
 0x1cc   :  { %v3172_v46 = vmax.f32 %v3170_v36, %v3171_v59  ;;  %v2941_v7 = vrot.slane %v2940_v42, 4  ;;  %v2997_v29 = vrot.slane %v2996_v19, 4  ;;  %v2672_v39 = vcombine.low %v3833_v6, %v2653_v16 }
 0x1cd   :  { %v2935_v44 = vmax.f32 %v2933_v8, %v2934_v47  ;;  %v2991_v0 = vmax.f32 %v2989_v57, %v2990_v17  ;;  %v2673_v50 = vcombine.high %v3833_v6, %v2653_v16  ;;  %v2674_v31 = vcombine.low %v3836_v4, %v2662_v43 }
 0x1ce   :  { %v3173_v54 = vrot.slane %v3172_v46, 1  ;;  %v2942_v61 = vmax.f32 %v2940_v42, %v2941_v7  ;;  %v2998_v15 = vmax.f32 %v2996_v19, %v2997_v29  ;;  %v2675_v1 = vcombine.high %v3836_v4, %v2662_v43 }
 0x1cf   :  { %v2936_v2 = vrot.slane %v2935_v44, 2  ;;  %v2992_v49 = vrot.slane %v2991_v0, 2  ;;  %v2676_v34 = vcombine.low %v3846_v11, %v2669_v48  ;;  %v2770_v45 = vsel %vm2678_vm0, %v2670_v9, -inf }
 0x1d0   :  { %v3174_v22 = vmax.f32 %v3172_v46, %v3173_v54  ;;  %v2943_v63 = vrot.slane %v2942_v61, 2  ;;  %v2999_v26 = vrot.slane %v2998_v15, 2  ;;  %v2771_v33 = vsel %vm2678_vm0, %v2671_v13, -inf }
 0x1d1   :  { %v2937_v60 = vmax.f32 %v2935_v44, %v2936_v2  ;;  %v2993_v6 = vmax.f32 %v2991_v0, %v2992_v49  ;;  %v2677_v25 = vcombine.high %v3846_v11, %v2669_v48  ;;  %v2772_v38 = vmax.f32 %v2770_v45, %v2771_v33 }
 0x1d2   :  { %3183 = vst.msk [vmem:[%s3966_s1] sm:$0x1] %vm3182_vm8, %v3174_v22  ;;  %v2944_v4 = vmax.f32 %v2942_v61, %v2943_v63  ;;  %v3000_v32 = vmax.f32 %v2998_v15, %v2999_v26  ;;  %v2773_v52 = vsel %vm2678_vm0, %v2672_v39, -inf  ;;  %v2784_v37 = vsel %vm2678_vm0, %v2674_v31, -inf }
 0x1d3   :  { %v2938_v51 = vrot.slane %v2937_v60, 1  ;;  %v2994_v3 = vrot.slane %v2993_v6, 1  ;;  %v2774_v12 = vmax.f32 %v2772_v38, %v2773_v52  ;;  %v2785_v20 = vsel %vm2678_vm0, %v2675_v1, -inf }
 0x1d4   :  { %v2945_v28 = vrot.slane %v2944_v4, 1  ;;  %v3001_v5 = vrot.slane %v3000_v32, 1  ;;  %v2775_v11 = vsel %vm2678_vm0, %v2673_v50, -inf  ;;  %v2786_v55 = vmax.f32 %v2784_v37, %v2785_v20 }
 0x1d5   :  { %v2939_v24 = vmax.f32 %v2937_v60, %v2938_v51  ;;  %v2995_v53 = vmax.f32 %v2993_v6, %v2994_v3  ;;  %v2776_v21 = vmax.f32 %v2774_v12, %v2775_v11  ;;  %v2787_v36 = vsel %vm2678_vm0, %v2676_v34, -inf }
 0x1d6   :  { %v2902_v23 = vmax.f32 %v3618_v18, %v2901_v30  ;;  %v2946_v62 = vmax.f32 %v2944_v4, %v2945_v28  ;;  %v3002_v16 = vmax.f32 %v3000_v32, %v3001_v5  ;;  %v2788_v41 = vmax.f32 %v2786_v55, %v2787_v36 }
 0x1d7   :  { %v3031_v43 = vsel %vm3026_vm4, %v3613_v56, %v2939_v24  ;;  %v2789_v48 = vsel %vm2678_vm0, %v2677_v25, -inf  ;;  %v2947_v9 = vsel %vm2791_vm1, %v2776_v21, -inf  ;;  %v3003_v59 = vsel %vm2848_vm2, %v2776_v21, -inf }
 0x1d8   :  { %v3032_v8 = vsel %vm3026_vm4, %v3616_v35, %v2946_v62  ;;  %v3040_v57 = vsel %vm3035_vm5, %v3031_v43, %v2995_v53  ;;  %v2790_v13 = vmax.f32 %v2788_v41, %v2789_v48  ;;  %v2948_v47 = vrot.slane %v2947_v9, 4 }
 0x1d9   :  { %v2896_v18 = vrot.slane %v3646_v58, 1  ;;  %v3041_v30 = vsel %vm3035_vm5, %v3032_v8, %v3002_v16  ;;  %v3070_v42 = vsel %vm2791_vm1, %v3040_v57, -inf  ;;  %v3004_v56 = vrot.slane %v3003_v59, 4 }
 0x1da   :  { %v3054_v17 = vcombine.low %v3040_v57, %v3041_v30  ;;  %v3071_v19 = vsel %vm2791_vm1, %v3041_v30, -inf  ;;  %v2949_v46 = vmax.f32 %v2947_v9, %v2948_v47  ;;  %v2954_v7 = vsel %vm2791_vm1, %v2790_v13, -inf }
 0x1db   :  { %v3072_v29 = vmax.f32 %v3070_v42, %v3071_v19  ;;  %v2955_v39 = vrot.slane %v2954_v7, 4  ;;  %v3005_v35 = vmax.f32 %v3003_v59, %v3004_v56  ;;  %v3010_v44 = vsel %vm2848_vm2, %v2790_v13, -inf }
 0x1dc   :  { %v2840_v0 = vmax.f32 %v3629_v40, %v2839_v14  ;;  %v2846_v50 = vrot.slane %v3777_v10, 1  ;;  %3062 = vst.msk [vmem:[%s3966_s1 + $0x1d] sm:$0xff] %vm2678_vm0, %v3054_v17  ;;  %v2950_v31 = vrot.slane %v2949_v46, 2  ;;  %v3011_v54 = vrot.slane %v3010_v44, 4 }
 0x1dd   :  { %v3091_v61 = vsel %vm3076_vm6, %v3072_v29, -inf  ;;  %v3120_v15 = vsel %vm3105_vm7, %v3072_v29, -inf  ;;  %v2956_v1 = vmax.f32 %v2954_v7, %v2955_v39  ;;  %v3006_v2 = vrot.slane %v3005_v35, 2 }
 0x1de   :  { %v2897_v49 = vmax.f32 %v3646_v58, %v2896_v18  ;;  %v2903_v34 = vrot.slane %v2902_v23, 1  ;;  %v2951_v45 = vmax.f32 %v2949_v46, %v2950_v31  ;;  %v3012_v40 = vmax.f32 %v3010_v44, %v3011_v54 }
 0x1df   :  { %v3092_v14 = vrot.slane %v3091_v61, 4  ;;  %v3121_v22 = vrot.slane %v3120_v15, 4  ;;  %v2957_v63 = vrot.slane %v2956_v1, 2  ;;  %v3007_v26 = vmax.f32 %v3005_v35, %v3006_v2 }
 0x1e0   :  { %v2952_v33 = vrot.slane %v2951_v45, 1  ;;  %v3013_v60 = vrot.slane %v3012_v40, 2  ;;  %v2847_v6 = vmax.f32 %v3777_v10, %v2846_v50  ;;  %v2904_v4 = vmax.f32 %v2902_v23, %v2903_v34 }
 0x1e1   :  { %v2958_v25 = vmax.f32 %v2956_v1, %v2957_v63  ;;  %v3008_v38 = vrot.slane %v3007_v26, 1  ;;  %v3024_v32 = vsel %vm3017_vm3, %v2840_v0, %v2897_v49  ;;  %v3093_v51 = vmax.f32 %v3091_v61, %v3092_v14 }
 0x1e2   :  { %v2953_v52 = vmax.f32 %v2951_v45, %v2952_v33  ;;  %v3014_v37 = vmax.f32 %v3012_v40, %v3013_v60  ;;  %v3122_v58 = vmax.f32 %v3120_v15, %v3121_v22  ;;  %v3025_v55 = vsel %vm3017_vm3, %v2847_v6, %v2904_v4 }
 0x1e3   :  { %v2959_v3 = vrot.slane %v2958_v25, 1  ;;  %v3009_v12 = vmax.f32 %v3007_v26, %v3008_v38  ;;  %v3094_v24 = vrot.slane %v3093_v51, 2 }
 0x1e4   :  { %v3015_v20 = vrot.slane %v3014_v37, 1  ;;  %v3033_v28 = vsel %vm3026_vm4, %v3024_v32, %v2953_v52  ;;  %v3123_v53 = vrot.slane %v3122_v58, 2 }
 0x1e5   :  { %v2960_v5 = vmax.f32 %v2958_v25, %v2959_v3  ;;  %v3042_v11 = vsel %vm3035_vm5, %v3033_v28, %v3009_v12  ;;  %v3095_v43 = vmax.f32 %v3093_v51, %v3094_v24 }
 0x1e6   :  { %v3016_v10 = vmax.f32 %v3014_v37, %v3015_v20  ;;  %v3073_v36 = vsel %vm2791_vm1, %v3042_v11, -inf  ;;  %v3124_v48 = vmax.f32 %v3122_v58, %v3123_v53 }
 0x1e7   :  { %v3034_v21 = vsel %vm3026_vm4, %v3025_v55, %v2960_v5  ;;  %v3096_v13 = vrot.slane %v3095_v43, 1 }
 0x1e8   :  { %v3043_v23 = vsel %vm3035_vm5, %v3034_v21, %v3016_v10  ;;  %v3125_v47 = vrot.slane %v3124_v48, 1 }
 0x1e9   :  { %v3055_v62 = vcombine.low %v3042_v11, %v3043_v23  ;;  %v3074_v16 = vsel %vm2791_vm1, %v3043_v23, -inf  ;;  %v3097_v17 = vmax.f32 %v3095_v43, %v3096_v13 }
 0x1ea   :  { %v3075_v41 = vmax.f32 %v3073_v36, %v3074_v16  ;;  %v3126_v19 = vmax.f32 %v3124_v48, %v3125_v47 }
 0x1eb   :  { %3063 = vst.msk [vmem:[%s3966_s1 + $0x25] sm:$0xff] %vm2678_vm0, %v3055_v62 }
 0x1ec   :  { %v3098_v9 = vsel %vm3076_vm6, %v3075_v41, -inf  ;;  %v3127_v59 = vsel %vm3105_vm7, %v3075_v41, -inf  ;;  %v3136_v35 = vsel %vm3017_vm3, %v3097_v17, %v3126_v19 }
 0x1ed   :  { %v3099_v8 = vrot.slane %v3098_v9, 4  ;;  %v3128_v57 = vrot.slane %v3127_v59, 4  ;;  %v3165_v31 = vsel %vm3076_vm6, %v3136_v35, -inf }
 0x1ef   :  { %v3100_v18 = vmax.f32 %v3098_v9, %v3099_v8  ;;  %v3129_v30 = vmax.f32 %v3127_v59, %v3128_v57 }
 0x1f1   :  { %v3101_v42 = vrot.slane %v3100_v18, 2  ;;  %v3130_v56 = vrot.slane %v3129_v30, 2 }
 0x1f3   :  { %v3102_v46 = vmax.f32 %v3100_v18, %v3101_v42  ;;  %v3131_v7 = vmax.f32 %v3129_v30, %v3130_v56 }
 0x1f5   :  { %v3103_v29 = vrot.slane %v3102_v46, 1  ;;  %v3132_v39 = vrot.slane %v3131_v7, 1 }
 0x1f7   :  { %v3104_v44 = vmax.f32 %v3102_v46, %v3103_v29  ;;  %v3133_v0 = vmax.f32 %v3131_v7, %v3132_v39 }
 0x1f9   :  { %v3137_v50 = vsel %vm3017_vm3, %v3104_v44, %v3133_v0 }
 0x1fa   :  { %v3150_v54 = vcombine.low %v3136_v35, %v3137_v50  ;;  %v3166_v61 = vsel %vm3076_vm6, %v3137_v50, -inf }
 0x1fb   :  { %v3167_v15 = vmax.f32 %v3165_v31, %v3166_v61 }
 0x1fc   :  { %v3157_v1 = vrot.slane %v3150_v54, %v3241_v27 }
 0x1fd   :  { %v3175_v2 = vsel %vm3076_vm6, %v3167_v15, -inf }
 0x1fe   :  { %3161 = vst.msk [vmem:[%s3966_s1 + $0x19] sm:$0xf] %vm2791_vm1, %v3157_v1  ;;  %v3176_v49 = vrot.slane %v3175_v2, 4 }
 0x200   :  { %v3177_v34 = vmax.f32 %v3175_v2, %v3176_v49 }
 0x202   :  { %v3178_v45 = vrot.slane %v3177_v34, 2 }
 0x204   :  { %v3179_v40 = vmax.f32 %v3177_v34, %v3178_v45 }
 0x206   :  { %v3180_v14 = vrot.slane %v3179_v40, 1 }
 0x208   :  { %v3181_v22 = vmax.f32 %v3179_v40, %v3180_v14 }
 0x20a   :  { %3184 = vst.msk [vmem:[%s3966_s1 + $0x18] sm:$0x1] %vm3182_vm8, %v3181_v22 }
 0x20b   :  { %3189 = vsyncpa [#allocation3], 1 }

// kernel: tpu_custom_call.1
= control target key start
LH: loop header
LB: loop body
LE: loop exit
PB: predicated region body
PF: predicated region fallthrough
CT: control target
= control target key end

     0   :  { %vm72_vm0 = vcmask 31744   ;;  %v540_v38 = vlaneseq  ;;  %vm185_vm1 = vcmask 27648   ;;  %vm242_vm2 = vcmask 31748   ;;  %s1097_s0 = inlined_call_operand.vmem [shape: f32[2,16,16,4], index: 0, kind: input, shape index: {}]   ;;  %s1098_s1 = inlined_call_operand.vmem [shape: f32[2,21,4], index: 1, kind: output, shape index: {}]  }
   0x1   :  { %v8_v0 = vld [vmem:[%s1097_s0] sm:$0xff]  ;;  %v9_v1 = vld [vmem:[%s1097_s0 + $0x8] sm:$0xff]  ;;  %v10_v2 = vld [vmem:[%s1097_s0 + $0x10] sm:$0xff]  ;;  %vm411_vm3 = vcmask 1040384   ;;  %vm420_vm4 = vcmask 1041408   ;;  %vm429_vm5 = vcmask 1042432  }
   0x2   :  { %v11_v3 = vld [vmem:[%s1097_s0 + $0x18] sm:$0xff]  ;;  %v12_v4 = vld [vmem:[%s1097_s0 + $0x20] sm:$0xff]  ;;  %v13_v5 = vld [vmem:[%s1097_s0 + $0x28] sm:$0xff]  ;;  %v73_v6 = vsel %vm72_vm0, %v8_v0, -inf  ;;  %v74_v7 = vsel %vm72_vm0, %v10_v2, -inf  ;;  %v80_v8 = vsel %vm72_vm0, %v9_v1, -inf }
   0x3   :  { %v14_v9 = vld [vmem:[%s1097_s0 + $0x30] sm:$0xff]  ;;  %v16_v10 = vld [vmem:[%s1097_s0 + $0x40] sm:$0xff]  ;;  %v75_v11 = vmax.f32 %v73_v6, %v74_v7  ;;  %v76_v12 = vsel %vm72_vm0, %v12_v4, -inf  ;;  %v81_v13 = vsel %vm72_vm0, %v11_v3, -inf  ;;  %v17_v14 = vld [vmem:[%s1097_s0 + $0x48] sm:$0xff]  ;;  %v83_v18 = vsel %vm72_vm0, %v13_v5, -inf }
   0x4   :  { %v18_v15 = vld [vmem:[%s1097_s0 + $0x50] sm:$0xff]  ;;  %v19_v16 = vld [vmem:[%s1097_s0 + $0x58] sm:$0xff]  ;;  %v82_v17 = vmax.f32 %v80_v8, %v81_v13  ;;  %v87_v19 = vsel %vm72_vm0, %v16_v10, -inf  ;;  %v20_v21 = vld [vmem:[%s1097_s0 + $0x60] sm:$0xff]  ;;  %v94_v25 = vsel %vm72_vm0, %v17_v14, -inf  ;;  %v78_v30 = vsel %vm72_vm0, %v14_v9, -inf }
   0x5   :  { %v15_v20 = vld [vmem:[%s1097_s0 + $0x38] sm:$0xff]  ;;  %v21_v22 = vld [vmem:[%s1097_s0 + $0x68] sm:$0xff]  ;;  %v77_v23 = vmax.f32 %v75_v11, %v76_v12  ;;  %v88_v24 = vsel %vm72_vm0, %v18_v15, -inf  ;;  %v95_v26 = vsel %vm72_vm0, %v19_v16, -inf  ;;  %v22_v27 = vld [vmem:[%s1097_s0 + $0x70] sm:$0xff]  ;;  %v90_v32 = vsel %vm72_vm0, %v20_v21, -inf }
   0x6   :  { %v24_v28 = vld [vmem:[%s1097_s0 + $0x80] sm:$0xff]  ;;  %v25_v29 = vld [vmem:[%s1097_s0 + $0x88] sm:$0xff]  ;;  %v89_v31 = vmax.f32 %v87_v19, %v88_v24  ;;  %v26_v33 = vld [vmem:[%s1097_s0 + $0x90] sm:$0xff]  ;;  %v84_v36 = vmax.f32 %v82_v17, %v83_v18  ;;  %v96_v37 = vmax.f32 %v94_v25, %v95_v26  ;;  %v85_v41 = vsel %vm72_vm0, %v15_v20, -inf }
   0x7   :  { %v27_v34 = vld [vmem:[%s1097_s0 + $0x98] sm:$0xff]  ;;  %v28_v35 = vld [vmem:[%s1097_s0 + $0xa0] sm:$0xff]  ;;  %v29_v40 = vld [vmem:[%s1097_s0 + $0xa8] sm:$0xff]  ;;  %v97_v42 = vsel %vm72_vm0, %v21_v22, -inf  ;;  %v101_v43 = vsel %vm72_vm0, %v24_v28, -inf  ;;  %v102_v44 = vsel %vm72_vm0, %v26_v33, -inf  ;;  %v686_v48 = vmax.f32 %v77_v23, %v78_v30 }
   0x8   :  { %v23_v39 = vld [vmem:[%s1097_s0 + $0x78] sm:$0xff]  ;;  %v30_v45 = vld [vmem:[%s1097_s0 + $0xb0] sm:$0xff]  ;;  %v32_v46 = vld [vmem:[%s1097_s0 + $0xc0] sm:$0xff]  ;;  %v91_v49 = vmax.f32 %v89_v31, %v90_v32  ;;  %v92_v50 = vsel %vm72_vm0, %v22_v27, -inf  ;;  %v103_v51 = vmax.f32 %v101_v43, %v102_v44  ;;  %v104_v54 = vsel %vm72_vm0, %v28_v35, -inf }
   0x9   :  { %v34_v47 = vld [vmem:[%s1097_s0 + $0xd0] sm:$0xff]  ;;  %v31_v52 = vld [vmem:[%s1097_s0 + $0xb8] sm:$0xff]  ;;  %v36_v53 = vld [vmem:[%s1097_s0 + $0xe0] sm:$0xff]  ;;  %v108_v55 = vsel %vm72_vm0, %v25_v29, -inf  ;;  %v109_v56 = vsel %vm72_vm0, %v27_v34, -inf  ;;  %v111_v57 = vsel %vm72_vm0, %v29_v40, -inf  ;;  %v708_v61 = vmax.f32 %v84_v36, %v85_v41 }
   0xa   :  { %v33_v58 = vld [vmem:[%s1097_s0 + $0xc8] sm:$0xff]  ;;  %v35_v59 = vld [vmem:[%s1097_s0 + $0xd8] sm:$0xff]  ;;  %v98_v62 = vmax.f32 %v96_v37, %v97_v42  ;;  %v99_v63 = vsel %vm72_vm0, %v23_v39, -inf  ;;  %v110_v0 = vmax.f32 %v108_v55, %v109_v56  ;;  %v38_v1 = vld [vmem:[%s1097_s0 + $0xf0] sm:$0xff]  ;;  %v106_v3 = vsel %vm72_vm0, %v30_v45, -inf }
   0xb   :  { %v37_v60 = vld [vmem:[%s1097_s0 + $0xe8] sm:$0xff]  ;;  %v39_v2 = vld [vmem:[%s1097_s0 + $0xf8] sm:$0xff]  ;;  %v115_v4 = vsel %vm72_vm0, %v32_v46, -inf  ;;  %v116_v5 = vsel %vm72_vm0, %v34_v47, -inf  ;;  %v118_v6 = vsel %vm72_vm0, %v36_v53, -inf  ;;  %v40_v7 = vld [vmem:[%s1097_s0 + $0x100] sm:$0xff]  ;;  %v730_v10 = vmax.f32 %v91_v49, %v92_v50 }
   0xc   :  { %v42_v8 = vld [vmem:[%s1097_s0 + $0x110] sm:$0xff]  ;;  %v44_v9 = vld [vmem:[%s1097_s0 + $0x120] sm:$0xff]  ;;  %v105_v11 = vmax.f32 %v103_v51, %v104_v54  ;;  %v112_v12 = vmax.f32 %v110_v0, %v111_v57  ;;  %v117_v13 = vmax.f32 %v115_v4, %v116_v5  ;;  %v41_v14 = vld [vmem:[%s1097_s0 + $0x108] sm:$0xff]  ;;  %v113_v15 = vsel %vm72_vm0, %v31_v52, -inf }
   0xd   :  { %v122_v16 = vsel %vm72_vm0, %v33_v58, -inf  ;;  %v123_v17 = vsel %vm72_vm0, %v35_v59, -inf  ;;  %v125_v18 = vsel %vm72_vm0, %v37_v60, -inf  ;;  %v43_v19 = vld [vmem:[%s1097_s0 + $0x118] sm:$0xff]  ;;  %v45_v20 = vld [vmem:[%s1097_s0 + $0x128] sm:$0xff]  ;;  %v46_v21 = vld [vmem:[%s1097_s0 + $0x130] sm:$0xff]  ;;  %v748_v22 = vmax.f32 %v98_v62, %v99_v63 }
   0xe   :  { %v119_v23 = vmax.f32 %v117_v13, %v118_v6  ;;  %v120_v24 = vsel %vm72_vm0, %v38_v1, -inf  ;;  %v124_v25 = vmax.f32 %v122_v16, %v123_v17  ;;  %v47_v26 = vld [vmem:[%s1097_s0 + $0x138] sm:$0xff]  ;;  %v127_v27 = vsel %vm72_vm0, %v39_v2, -inf  ;;  %v48_v31 = vld [vmem:[%s1097_s0 + $0x140] sm:$0xff]  ;;  %v50_v32 = vld [vmem:[%s1097_s0 + $0x150] sm:$0xff] }
   0xf   :  { %v129_v28 = vsel %vm72_vm0, %v40_v7, -inf  ;;  %v130_v29 = vsel %vm72_vm0, %v42_v8, -inf  ;;  %v132_v30 = vsel %vm72_vm0, %v44_v9, -inf  ;;  %v52_v33 = vld [vmem:[%s1097_s0 + $0x160] sm:$0xff]  ;;  %v767_v34 = vmax.f32 %v105_v11, %v106_v3  ;;  %v49_v39 = vld [vmem:[%s1097_s0 + $0x148] sm:$0xff]  ;;  %v54_v40 = vld [vmem:[%s1097_s0 + $0x170] sm:$0xff] }
  0x10   :  { %v769_v35 = vmax.f32 %v112_v12, %v113_v15  ;;  %v126_v36 = vmax.f32 %v124_v25, %v125_v18  ;;  %v131_v37 = vmax.f32 %v129_v28, %v130_v29  ;;  %v134_v41 = vsel %vm72_vm0, %v46_v21, -inf  ;;  %v51_v45 = vld [vmem:[%s1097_s0 + $0x158] sm:$0xff]  ;;  %v53_v46 = vld [vmem:[%s1097_s0 + $0x168] sm:$0xff]  ;;  %v56_v53 = vld [vmem:[%s1097_s0 + $0x180] sm:$0xff] }
  0x11   :  { %v136_v42 = vsel %vm72_vm0, %v41_v14, -inf  ;;  %v137_v43 = vsel %vm72_vm0, %v43_v19, -inf  ;;  %v139_v44 = vsel %vm72_vm0, %v45_v20, -inf  ;;  %v55_v47 = vld [vmem:[%s1097_s0 + $0x178] sm:$0xff]  ;;  %v790_v49 = vmax.f32 %v119_v23, %v120_v24  ;;  %v57_v54 = vld [vmem:[%s1097_s0 + $0x188] sm:$0xff]  ;;  %v58_v59 = vld [vmem:[%s1097_s0 + $0x190] sm:$0xff] }
  0x12   :  { %v792_v50 = vmax.f32 %v126_v36, %v127_v27  ;;  %v133_v51 = vmax.f32 %v131_v37, %v132_v30  ;;  %v138_v52 = vmax.f32 %v136_v42, %v137_v43  ;;  %v141_v55 = vsel %vm72_vm0, %v47_v26, -inf  ;;  %v60_v60 = vld [vmem:[%s1097_s0 + $0x1a0] sm:$0xff]  ;;  %v62_v62 = vld [vmem:[%s1097_s0 + $0x1b0] sm:$0xff]  ;;  %v59_v3 = vld [vmem:[%s1097_s0 + $0x198] sm:$0xff] }
  0x13   :  { %v143_v56 = vsel %vm72_vm0, %v48_v31, -inf  ;;  %v144_v57 = vsel %vm72_vm0, %v50_v32, -inf  ;;  %v146_v58 = vsel %vm72_vm0, %v52_v33, -inf  ;;  %v148_v2 = vsel %vm72_vm0, %v54_v40, -inf  ;;  %v61_v8 = vld [vmem:[%s1097_s0 + $0x1a8] sm:$0xff]  ;;  %v63_v9 = vld [vmem:[%s1097_s0 + $0x1b8] sm:$0xff] }
  0x14   :  { %v813_v63 = vmax.f32 %v133_v51, %v134_v41  ;;  %v140_v0 = vmax.f32 %v138_v52, %v139_v44  ;;  %v145_v1 = vmax.f32 %v143_v56, %v144_v57  ;;  %v150_v4 = vsel %vm72_vm0, %v49_v39, -inf  ;;  %v64_v11 = vld [vmem:[%s1097_s0 + $0x1c0] sm:$0xff]  ;;  %v66_v16 = vld [vmem:[%s1097_s0 + $0x1d0] sm:$0xff]  ;;  %v65_v23 = vld [vmem:[%s1097_s0 + $0x1c8] sm:$0xff] }
  0x15   :  { %v151_v5 = vsel %vm72_vm0, %v51_v45, -inf  ;;  %v153_v6 = vsel %vm72_vm0, %v53_v46, -inf  ;;  %v155_v7 = vsel %vm72_vm0, %v55_v47, -inf  ;;  %v157_v15 = vsel %vm72_vm0, %v56_v53, -inf  ;;  %v68_v17 = vld [vmem:[%s1097_s0 + $0x1e0] sm:$0xff]  ;;  %v70_v24 = vld [vmem:[%s1097_s0 + $0x1f0] sm:$0xff] }
  0x16   :  { %v832_v12 = vmax.f32 %v140_v0, %v141_v55  ;;  %v147_v13 = vmax.f32 %v145_v1, %v146_v58  ;;  %v152_v14 = vmax.f32 %v150_v4, %v151_v5  ;;  %v158_v18 = vsel %vm72_vm0, %v58_v59, -inf  ;;  %v67_v29 = vld [vmem:[%s1097_s0 + $0x1d8] sm:$0xff]  ;;  %v69_v30 = vld [vmem:[%s1097_s0 + $0x1e8] sm:$0xff] }
  0x17   :  { %v160_v19 = vsel %vm72_vm0, %v60_v60, -inf  ;;  %v162_v20 = vsel %vm72_vm0, %v62_v62, -inf  ;;  %v164_v21 = vsel %vm72_vm0, %v57_v54, -inf  ;;  %v159_v27 = vmax.f32 %v157_v15, %v158_v18  ;;  %v71_v31 = vld [vmem:[%s1097_s0 + $0x1f8] sm:$0xff] }
  0x18   :  { %v851_v25 = vmax.f32 %v147_v13, %v148_v2  ;;  %v154_v26 = vmax.f32 %v152_v14, %v153_v6  ;;  %v165_v28 = vsel %vm72_vm0, %v59_v3, -inf  ;;  %v167_v33 = vsel %vm72_vm0, %v61_v8, -inf }
  0x19   :  { %v166_v32 = vmax.f32 %v164_v21, %v165_v28  ;;  %v169_v36 = vsel %vm72_vm0, %v63_v9, -inf  ;;  %v171_v37 = vsel %vm72_vm0, %v64_v11, -inf  ;;  %v161_v40 = vmax.f32 %v159_v27, %v160_v19 }
  0x1a   :  { %v866_v39 = vmax.f32 %v154_v26, %v155_v7  ;;  %v172_v41 = vsel %vm72_vm0, %v66_v16, -inf  ;;  %v174_v42 = vsel %vm72_vm0, %v68_v17, -inf  ;;  %v176_v45 = vsel %vm72_vm0, %v70_v24, -inf }
  0x1b   :  { %v168_v43 = vmax.f32 %v166_v32, %v167_v33  ;;  %v173_v44 = vmax.f32 %v171_v37, %v172_v41  ;;  %v178_v46 = vsel %vm72_vm0, %v65_v23, -inf  ;;  %v872_v47 = vmax.f32 %v161_v40, %v162_v20 }
  0x1c   :  { %v179_v51 = vsel %vm72_vm0, %v67_v29, -inf  ;;  %v181_v52 = vsel %vm72_vm0, %v69_v30, -inf  ;;  %v183_v53 = vsel %vm72_vm0, %v71_v31, -inf  ;;  %v186_v57 = vsel %vm185_vm1, %v686_v48, -inf }
  0x1d   :  { %v877_v54 = vmax.f32 %v168_v43, %v169_v36  ;;  %v175_v55 = vmax.f32 %v173_v44, %v174_v42  ;;  %v180_v56 = vmax.f32 %v178_v46, %v179_v51  ;;  %v187_v58 = vrot.slane %v186_v57, 4 }
  0x1e   :  { %v193_v59 = vsel %vm185_vm1, %v730_v10, -inf  ;;  %v200_v60 = vsel %vm185_vm1, %v767_v34, -inf  ;;  %v207_v62 = vsel %vm185_vm1, %v790_v49, -inf  ;;  %v214_v6 = vsel %vm185_vm1, %v813_v63, -inf }
  0x1f   :  { %v887_v0 = vmax.f32 %v175_v55, %v176_v45  ;;  %v182_v1 = vmax.f32 %v180_v56, %v181_v52  ;;  %v194_v2 = vrot.slane %v193_v59, 4  ;;  %v201_v3 = vrot.slane %v200_v60, 4 }
  0x20   :  { %v188_v4 = vmax.f32 %v186_v57, %v187_v58  ;;  %v208_v5 = vrot.slane %v207_v62, 4  ;;  %v221_v7 = vsel %vm185_vm1, %v851_v25, -inf  ;;  %v215_v13 = vrot.slane %v214_v6, 4 }
  0x21   :  { %v893_v8 = vmax.f32 %v182_v1, %v183_v53  ;;  %v195_v9 = vmax.f32 %v193_v59, %v194_v2  ;;  %v202_v11 = vmax.f32 %v200_v60, %v201_v3  ;;  %v222_v16 = vrot.slane %v221_v7, 4 }
  0x22   :  { %v189_v14 = vrot.slane %v188_v4, 2  ;;  %v209_v15 = vmax.f32 %v207_v62, %v208_v5  ;;  %v228_v17 = vsel %vm185_vm1, %v872_v47, -inf  ;;  %v216_v20 = vmax.f32 %v214_v6, %v215_v13 }
  0x23   :  { %v196_v18 = vrot.slane %v195_v9, 2  ;;  %v203_v19 = vrot.slane %v202_v11, 2  ;;  %v229_v21 = vrot.slane %v228_v17, 4  ;;  %v223_v26 = vmax.f32 %v221_v7, %v222_v16 }
  0x24   :  { %v190_v23 = vmax.f32 %v188_v4, %v189_v14  ;;  %v210_v24 = vrot.slane %v209_v15, 2  ;;  %v235_v27 = vsel %vm185_vm1, %v887_v0, -inf  ;;  %v217_v30 = vrot.slane %v216_v20, 2 }
  0x25   :  { %v197_v28 = vmax.f32 %v195_v9, %v196_v18  ;;  %v204_v29 = vmax.f32 %v202_v11, %v203_v19  ;;  %v230_v31 = vmax.f32 %v228_v17, %v229_v21  ;;  %v224_v36 = vrot.slane %v223_v26, 2 }
  0x26   :  { %v191_v32 = vrot.slane %v190_v23, 1  ;;  %v211_v33 = vmax.f32 %v209_v15, %v210_v24  ;;  %v236_v37 = vrot.slane %v235_v27, 4  ;;  %v218_v42 = vmax.f32 %v216_v20, %v217_v30 }
  0x27   :  { %v198_v40 = vrot.slane %v197_v28, 1  ;;  %v205_v41 = vrot.slane %v204_v29, 1  ;;  %v231_v43 = vrot.slane %v230_v31, 2  ;;  %v225_v46 = vmax.f32 %v223_v26, %v224_v36 }
  0x28   :  { %v899_v44 = vmax.f32 %v190_v23, %v191_v32  ;;  %v212_v45 = vrot.slane %v211_v33, 1  ;;  %v237_v51 = vmax.f32 %v235_v27, %v236_v37  ;;  %v219_v55 = vrot.slane %v218_v42, 1 }
  0x29   :  { %v901_v52 = vmax.f32 %v197_v28, %v198_v40  ;;  %v903_v53 = vmax.f32 %v204_v29, %v205_v41  ;;  %v232_v56 = vmax.f32 %v230_v31, %v231_v43  ;;  %v226_v58 = vrot.slane %v225_v46, 1 }
  0x2a   :  { %v905_v57 = vmax.f32 %v211_v33, %v212_v45  ;;  %v238_v59 = vrot.slane %v237_v51, 2  ;;  %v243_v60 = vsel %vm242_vm2, %v686_v48, -inf  ;;  %v909_v62 = vmax.f32 %v218_v42, %v219_v55 }
  0x2b   :  { %v233_v1 = vrot.slane %v232_v56, 1  ;;  %v244_v2 = vrot.slane %v243_v60, 4  ;;  %v250_v3 = vsel %vm242_vm2, %v730_v10, -inf  ;;  %v913_v4 = vmax.f32 %v225_v46, %v226_v58 }
  0x2c   :  { %v239_v5 = vmax.f32 %v237_v51, %v238_v59  ;;  %v251_v6 = vrot.slane %v250_v3, 4  ;;  %v257_v7 = vsel %vm242_vm2, %v767_v34, -inf  ;;  %v264_v48 = vsel %vm242_vm2, %v790_v49, -inf }
  0x2d   :  { %v917_v9 = vmax.f32 %v232_v56, %v233_v1  ;;  %v245_v11 = vmax.f32 %v243_v60, %v244_v2  ;;  %v258_v13 = vrot.slane %v257_v7, 4  ;;  %v265_v16 = vrot.slane %v264_v48, 4 }
  0x2e   :  { %v240_v14 = vrot.slane %v239_v5, 1  ;;  %v252_v15 = vmax.f32 %v250_v3, %v251_v6  ;;  %v271_v10 = vsel %vm242_vm2, %v813_v63, -inf  ;;  %v278_v20 = vsel %vm242_vm2, %v851_v25, -inf }
  0x2f   :  { %v246_v17 = vrot.slane %v245_v11, 2  ;;  %v259_v18 = vmax.f32 %v257_v7, %v258_v13  ;;  %v272_v19 = vrot.slane %v271_v10, 4  ;;  %v266_v23 = vmax.f32 %v264_v48, %v265_v16 }
  0x30   :  { %v925_v34 = vmax.f32 %v239_v5, %v240_v14  ;;  %v253_v21 = vrot.slane %v252_v15, 2  ;;  %v279_v24 = vrot.slane %v278_v20, 4  ;;  %v285_v28 = vsel %vm242_vm2, %v872_v47, -inf }
  0x31   :  { %v247_v26 = vmax.f32 %v245_v11, %v246_v17  ;;  %v260_v27 = vrot.slane %v259_v18, 2  ;;  %v273_v49 = vmax.f32 %v271_v10, %v272_v19  ;;  %v267_v30 = vrot.slane %v266_v23, 2 }
  0x32   :  { %v254_v29 = vmax.f32 %v252_v15, %v253_v21  ;;  %v280_v63 = vmax.f32 %v278_v20, %v279_v24  ;;  %v286_v31 = vrot.slane %v285_v28, 4  ;;  %v292_v25 = vsel %vm242_vm2, %v887_v0, -inf }
  0x33   :  { %v248_v32 = vrot.slane %v247_v26, 1  ;;  %v261_v33 = vmax.f32 %v259_v18, %v260_v27  ;;  %v274_v36 = vrot.slane %v273_v49, 2  ;;  %v268_v40 = vmax.f32 %v266_v23, %v267_v30 }
  0x34   :  { %v255_v37 = vrot.slane %v254_v29, 1  ;;  %v281_v41 = vrot.slane %v280_v63, 2  ;;  %v287_v42 = vmax.f32 %v285_v28, %v286_v31  ;;  %v293_v51 = vrot.slane %v292_v25, 4 }
  0x35   :  { %v931_v43 = vmax.f32 %v247_v26, %v248_v32  ;;  %v262_v45 = vrot.slane %v261_v33, 1  ;;  %v275_v46 = vmax.f32 %v273_v49, %v274_v36  ;;  %v269_v55 = vrot.slane %v268_v40, 1 }
  0x36   :  { %v933_v47 = vmax.f32 %v254_v29, %v255_v37  ;;  %v282_v56 = vmax.f32 %v280_v63, %v281_v41  ;;  %v288_v58 = vrot.slane %v287_v42, 2  ;;  %v294_v1 = vmax.f32 %v292_v25, %v293_v51 }
  0x37   :  { %v935_v59 = vmax.f32 %v261_v33, %v262_v45  ;;  %v276_v60 = vrot.slane %v275_v46, 1  ;;  %v299_v0 = vsel %vm185_vm1, %v708_v61, -inf  ;;  %v939_v2 = vmax.f32 %v268_v40, %v269_v55 }
  0x38   :  { %v283_v3 = vrot.slane %v282_v56, 1  ;;  %v289_v5 = vmax.f32 %v287_v42, %v288_v58  ;;  %v300_v6 = vrot.slane %v299_v0, 4  ;;  %v295_v11 = vrot.slane %v294_v1, 2 }
  0x39   :  { %v941_v7 = vmax.f32 %v275_v46, %v276_v60  ;;  %v306_v13 = vsel %vm185_vm1, %v748_v22, -inf  ;;  %v313_v48 = vsel %vm185_vm1, %v769_v35, -inf  ;;  %v320_v19 = vsel %vm185_vm1, %v792_v50, -inf }
  0x3a   :  { %v947_v14 = vmax.f32 %v282_v56, %v283_v3  ;;  %v290_v15 = vrot.slane %v289_v5, 1  ;;  %v301_v16 = vmax.f32 %v299_v0, %v300_v6  ;;  %v307_v10 = vrot.slane %v306_v13, 4 }
  0x3b   :  { %v296_v17 = vmax.f32 %v294_v1, %v295_v11  ;;  %v314_v18 = vrot.slane %v313_v48, 4  ;;  %v327_v20 = vsel %vm185_vm1, %v832_v12, -inf  ;;  %v321_v26 = vrot.slane %v320_v19, 4 }
  0x3c   :  { %v953_v21 = vmax.f32 %v289_v5, %v290_v15  ;;  %v302_v23 = vrot.slane %v301_v16, 2  ;;  %v308_v24 = vmax.f32 %v306_v13, %v307_v10  ;;  %v328_v28 = vrot.slane %v327_v20, 4 }
  0x3d   :  { %v297_v27 = vrot.slane %v296_v17, 1  ;;  %v315_v49 = vmax.f32 %v313_v48, %v314_v18  ;;  %v334_v29 = vsel %vm185_vm1, %v866_v39, -inf  ;;  %v322_v31 = vmax.f32 %v320_v19, %v321_v26 }
  0x3e   :  { %v303_v30 = vmax.f32 %v301_v16, %v302_v23  ;;  %v309_v63 = vrot.slane %v308_v24, 2  ;;  %v335_v32 = vrot.slane %v334_v29, 4  ;;  %v329_v25 = vmax.f32 %v327_v20, %v328_v28 }
  0x3f   :  { %v957_v33 = vmax.f32 %v296_v17, %v297_v27  ;;  %v316_v36 = vrot.slane %v315_v49, 2  ;;  %v341_v37 = vsel %vm185_vm1, %v877_v54, -inf  ;;  %v323_v42 = vrot.slane %v322_v31, 2 }
  0x40   :  { %v304_v40 = vrot.slane %v303_v30, 1  ;;  %v310_v41 = vmax.f32 %v308_v24, %v309_v63  ;;  %v336_v45 = vmax.f32 %v334_v29, %v335_v32  ;;  %v330_v51 = vrot.slane %v329_v25, 2 }
  0x41   :  { %v317_v46 = vmax.f32 %v315_v49, %v316_v36  ;;  %v342_v55 = vrot.slane %v341_v37, 4  ;;  %v348_v56 = vsel %vm185_vm1, %v893_v8, -inf  ;;  %v324_v1 = vmax.f32 %v322_v31, %v323_v42 }
  0x42   :  { %v963_v58 = vmax.f32 %v303_v30, %v304_v40  ;;  %v311_v60 = vrot.slane %v310_v41, 1  ;;  %v337_v0 = vrot.slane %v336_v45, 2  ;;  %v331_v5 = vmax.f32 %v329_v25, %v330_v51 }
  0x43   :  { %v318_v3 = vrot.slane %v317_v46, 1  ;;  %v343_v6 = vmax.f32 %v341_v37, %v342_v55  ;;  %v349_v11 = vrot.slane %v348_v56, 4  ;;  %v325_v48 = vrot.slane %v324_v1, 1 }
  0x44   :  { %v965_v13 = vmax.f32 %v310_v41, %v311_v60  ;;  %v338_v15 = vmax.f32 %v336_v45, %v337_v0  ;;  %v355_v16 = vsel %vm242_vm2, %v708_v61, -inf  ;;  %v332_v17 = vrot.slane %v331_v5, 1 }
  0x45   :  { %v969_v10 = vmax.f32 %v317_v46, %v318_v3  ;;  %v344_v18 = vrot.slane %v343_v6, 2  ;;  %v350_v19 = vmax.f32 %v348_v56, %v349_v11  ;;  %v971_v20 = vmax.f32 %v324_v1, %v325_v48 }
  0x46   :  { %v339_v23 = vrot.slane %v338_v15, 1  ;;  %v356_v24 = vrot.slane %v355_v16, 4  ;;  %v362_v26 = vsel %vm242_vm2, %v748_v22, -inf  ;;  %v975_v27 = vmax.f32 %v331_v5, %v332_v17 }
  0x47   :  { %v345_v49 = vmax.f32 %v343_v6, %v344_v18  ;;  %v351_v28 = vrot.slane %v350_v19, 2  ;;  %v363_v29 = vrot.slane %v362_v26, 4  ;;  %v369_v63 = vsel %vm242_vm2, %v769_v35, -inf }
  0x48   :  { %v977_v30 = vmax.f32 %v338_v15, %v339_v23  ;;  %v357_v61 = vmax.f32 %v355_v16, %v356_v24  ;;  %v376_v31 = vsel %vm242_vm2, %v792_v50, -inf  ;;  %v370_v37 = vrot.slane %v369_v63, 4 }
  0x49   :  { %v346_v32 = vrot.slane %v345_v49, 1  ;;  %v352_v36 = vmax.f32 %v350_v19, %v351_v28  ;;  %v364_v25 = vmax.f32 %v362_v26, %v363_v29  ;;  %v377_v40 = vrot.slane %v376_v31, 4 }
  0x4a   :  { %v358_v22 = vrot.slane %v357_v61, 2  ;;  %v383_v41 = vsel %vm242_vm2, %v832_v12, -inf  ;;  %v390_v42 = vsel %vm242_vm2, %v866_v39, -inf  ;;  %v371_v35 = vmax.f32 %v369_v63, %v370_v37 }
  0x4b   :  { %v987_v45 = vmax.f32 %v345_v49, %v346_v32  ;;  %v353_v46 = vrot.slane %v352_v36, 1  ;;  %v365_v51 = vrot.slane %v364_v25, 2  ;;  %v378_v56 = vmax.f32 %v376_v31, %v377_v40 }
  0x4c   :  { %v359_v55 = vmax.f32 %v357_v61, %v358_v22  ;;  %v384_v50 = vrot.slane %v383_v41, 4  ;;  %v391_v60 = vrot.slane %v390_v42, 4  ;;  %v372_v3 = vrot.slane %v371_v35, 2 }
  0x4d   :  { %v354_v1 = vmax.f32 %v352_v36, %v353_v46  ;;  %v366_v0 = vmax.f32 %v364_v25, %v365_v51  ;;  %v397_v5 = vsel %vm242_vm2, %v877_v54, -inf  ;;  %v379_v6 = vrot.slane %v378_v56, 2 }
  0x4e   :  { %v360_v12 = vrot.slane %v359_v55, 1  ;;  %v385_v11 = vmax.f32 %v383_v41, %v384_v50  ;;  %v392_v39 = vmax.f32 %v390_v42, %v391_v60  ;;  %v373_v15 = vmax.f32 %v371_v35, %v372_v3 }
  0x4f   :  { %v367_v48 = vrot.slane %v366_v0, 1  ;;  %v398_v16 = vrot.slane %v397_v5, 4  ;;  %v404_v17 = vsel %vm242_vm2, %v893_v8, -inf  ;;  %v380_v19 = vmax.f32 %v378_v56, %v379_v6 }
  0x50   :  { %v361_v18 = vmax.f32 %v359_v55, %v360_v12  ;;  %v386_v23 = vrot.slane %v385_v11, 2  ;;  %v393_v24 = vrot.slane %v392_v39, 2  ;;  %v374_v49 = vrot.slane %v373_v15, 1 }
  0x51   :  { %v368_v26 = vmax.f32 %v366_v0, %v367_v48  ;;  %v399_v28 = vmax.f32 %v397_v5, %v398_v16  ;;  %v405_v29 = vrot.slane %v404_v17, 4  ;;  %v381_v54 = vrot.slane %v380_v19, 1 }
  0x52   :  { %v387_v61 = vmax.f32 %v385_v11, %v386_v23  ;;  %v394_v63 = vmax.f32 %v392_v39, %v393_v24  ;;  %v412_v31 = vsel %vm411_vm3, %v899_v44, %v931_v43  ;;  %v375_v32 = vmax.f32 %v373_v15, %v374_v49 }
  0x53   :  { %v400_v36 = vrot.slane %v399_v28, 2  ;;  %v406_v25 = vmax.f32 %v404_v17, %v405_v29  ;;  %v413_v8 = vsel %vm411_vm3, %v901_v52, %v933_v47  ;;  %v382_v37 = vmax.f32 %v380_v19, %v381_v54 }
  0x54   :  { %v388_v22 = vrot.slane %v387_v61, 1  ;;  %v395_v40 = vrot.slane %v394_v63, 1  ;;  %v414_v41 = vsel %vm411_vm3, %v903_v53, %v935_v59  ;;  %v415_v44 = vsel %vm411_vm3, %v905_v57, %v939_v2 }
  0x55   :  { %v401_v42 = vmax.f32 %v399_v28, %v400_v36  ;;  %v407_v46 = vrot.slane %v406_v25, 2  ;;  %v416_v43 = vsel %vm411_vm3, %v909_v62, %v941_v7  ;;  %vm470_vm6 = vcmask 25600  }
  0x56   :  { %v389_v51 = vmax.f32 %v387_v61, %v388_v22  ;;  %v396_v52 = vmax.f32 %v394_v63, %v395_v40  ;;  %v417_v47 = vsel %vm411_vm3, %v913_v4, %v947_v14  ;;  %v418_v53 = vsel %vm411_vm3, %v917_v9, %v953_v21 }
  0x57   :  { %v402_v59 = vrot.slane %v401_v42, 1  ;;  %v408_v35 = vmax.f32 %v406_v25, %v407_v46  ;;  %v419_v57 = vsel %vm411_vm3, %v925_v34, %v957_v33  ;;  %v421_v62 = vsel %vm420_vm4, %v412_v31, %v963_v58 }
  0x58   :  { %v422_v2 = vsel %vm420_vm4, %v413_v8, %v965_v13  ;;  %v423_v7 = vsel %vm420_vm4, %v414_v41, %v969_v10  ;;  %v424_v4 = vsel %vm420_vm4, %v415_v44, %v971_v20  ;;  %v425_v9 = vsel %vm420_vm4, %v416_v43, %v975_v27 }
  0x59   :  { %v403_v14 = vmax.f32 %v401_v42, %v402_v59  ;;  %v409_v21 = vrot.slane %v408_v35, 1  ;;  %v426_v34 = vsel %vm420_vm4, %v417_v47, %v977_v30  ;;  %v427_v33 = vsel %vm420_vm4, %v418_v53, %v987_v45 }
  0x5a   :  { %v428_v58 = vsel %vm420_vm4, %v419_v57, %v354_v1  ;;  %v430_v13 = vsel %vm429_vm5, %v421_v62, %v361_v18  ;;  %v431_v10 = vsel %vm429_vm5, %v422_v2, %v368_v26  ;;  %v432_v55 = vsel %vm429_vm5, %v423_v7, %v375_v32 }
  0x5b   :  { %v410_v20 = vmax.f32 %v408_v35, %v409_v21  ;;  %v433_v56 = vsel %vm429_vm5, %v424_v4, %v382_v37  ;;  %v434_v27 = vsel %vm429_vm5, %v425_v9, %v389_v51  ;;  %v435_v50 = vsel %vm429_vm5, %v426_v34, %v396_v52 }
  0x5c   :  { %v436_v30 = vsel %vm429_vm5, %v427_v33, %v403_v14  ;;  %v446_v60 = vcombine.low %v430_v13, %v431_v10  ;;  %v447_v0 = vcombine.low %v432_v55, %v433_v56  ;;  %v448_v45 = vcombine.low %v434_v27, %v435_v50 }
  0x5d   :  { %v437_v1 = vsel %vm429_vm5, %v428_v58, %v410_v20  ;;  %v458_v3 = vsel %vm185_vm1, %v430_v13, -inf  ;;  %v459_v5 = vsel %vm185_vm1, %v431_v10, -inf  ;;  %v461_v12 = vsel %vm185_vm1, %v432_v55, -inf }
  0x5e   :  { %v449_v6 = vcombine.low %v436_v30, %v437_v1  ;;  %454 = vst.msk [vmem:[%s1098_s1 + $0x5] sm:$0xff] %vm72_vm0, %v446_v60  ;;  %455 = vst.msk [vmem:[%s1098_s1 + $0xd] sm:$0xff] %vm72_vm0, %v447_v0  ;;  %v460_v11 = vmax.f32 %v458_v3, %v459_v5  ;;  %v462_v39 = vsel %vm185_vm1, %v433_v56, -inf  ;;  %v464_v48 = vsel %vm185_vm1, %v434_v27, -inf }
  0x5f   :  { %456 = vst.msk [vmem:[%s1098_s1 + $0x1d] sm:$0xff] %vm72_vm0, %v448_v45  ;;  %v463_v15 = vmax.f32 %v461_v12, %v462_v39  ;;  %v465_v16 = vsel %vm185_vm1, %v435_v50, -inf  ;;  %v467_v17 = vsel %vm185_vm1, %v436_v30, -inf  ;;  %v468_v18 = vsel %vm185_vm1, %v437_v1, -inf }
  0x60   :  { %457 = vst.msk [vmem:[%s1098_s1 + $0x25] sm:$0xff] %vm72_vm0, %v449_v6  ;;  %v466_v19 = vmax.f32 %v464_v48, %v465_v16  ;;  %v469_v23 = vmax.f32 %v467_v17, %v468_v18  ;;  %v471_v24 = vsel %vm470_vm6, %v460_v11, -inf  ;;  %vm499_vm7 = vcmask 27650  }
  0x61   :  { %v472_v26 = vrot.slane %v471_v24, 4  ;;  %v478_v49 = vsel %vm470_vm6, %v463_v15, -inf  ;;  %v500_v28 = vsel %vm499_vm7, %v460_v11, -inf  ;;  %v507_v29 = vsel %vm499_vm7, %v463_v15, -inf }
  0x62   :  { %v479_v54 = vrot.slane %v478_v49, 4  ;;  %v485_v61 = vsel %vm470_vm6, %v466_v19, -inf  ;;  %v492_v63 = vsel %vm470_vm6, %v469_v23, -inf  ;;  %v501_v31 = vrot.slane %v500_v28, 4 }
  0x63   :  { %v473_v32 = vmax.f32 %v471_v24, %v472_v26  ;;  %v486_v36 = vrot.slane %v485_v61, 4  ;;  %v493_v25 = vrot.slane %v492_v63, 4  ;;  %v508_v8 = vrot.slane %v507_v29, 4 }
  0x64   :  { %v480_v37 = vmax.f32 %v478_v49, %v479_v54  ;;  %v502_v22 = vmax.f32 %v500_v28, %v501_v31  ;;  %v514_v40 = vsel %vm499_vm7, %v466_v19, -inf  ;;  %v521_v41 = vsel %vm499_vm7, %v469_v23, -inf }
  0x65   :  { %v474_v42 = vrot.slane %v473_v32, 2  ;;  %v487_v46 = vmax.f32 %v485_v61, %v486_v36  ;;  %v494_v44 = vmax.f32 %v492_v63, %v493_v25  ;;  %v509_v43 = vmax.f32 %v507_v29, %v508_v8 }
  0x66   :  { %v481_v51 = vrot.slane %v480_v37, 2  ;;  %v503_v52 = vrot.slane %v502_v22, 2  ;;  %v515_v47 = vrot.slane %v514_v40, 4  ;;  %v522_v53 = vrot.slane %v521_v41, 4 }
  0x67   :  { %v475_v59 = vmax.f32 %v473_v32, %v474_v42  ;;  %v488_v35 = vrot.slane %v487_v46, 2  ;;  %v495_v57 = vrot.slane %v494_v44, 2  ;;  %v510_v62 = vrot.slane %v509_v43, 2 }
  0x68   :  { %v482_v2 = vmax.f32 %v480_v37, %v481_v51  ;;  %v504_v7 = vmax.f32 %v502_v22, %v503_v52  ;;  %v516_v4 = vmax.f32 %v514_v40, %v515_v47  ;;  %v523_v9 = vmax.f32 %v521_v41, %v522_v53 }
  0x69   :  { %v476_v14 = vrot.slane %v475_v59, 1  ;;  %v489_v21 = vmax.f32 %v487_v46, %v488_v35  ;;  %v496_v34 = vmax.f32 %v494_v44, %v495_v57  ;;  %v511_v33 = vmax.f32 %v509_v43, %v510_v62 }
  0x6a   :  { %v483_v58 = vrot.slane %v482_v2, 1  ;;  %v505_v13 = vrot.slane %v504_v7, 1  ;;  %v517_v10 = vrot.slane %v516_v4, 2  ;;  %v524_v55 = vrot.slane %v523_v9, 2 }
  0x6b   :  { %v477_v20 = vmax.f32 %v475_v59, %v476_v14  ;;  %v490_v56 = vrot.slane %v489_v21, 1  ;;  %v497_v27 = vrot.slane %v496_v34, 1  ;;  %v512_v50 = vrot.slane %v511_v33, 1 }
  0x6c   :  { %v484_v30 = vmax.f32 %v482_v2, %v483_v58  ;;  %v506_v60 = vmax.f32 %v504_v7, %v505_v13  ;;  %v518_v0 = vmax.f32 %v516_v4, %v517_v10  ;;  %v525_v45 = vmax.f32 %v523_v9, %v524_v55 }
  0x6d   :  { %v491_v1 = vmax.f32 %v489_v21, %v490_v56  ;;  %v498_v3 = vmax.f32 %v496_v34, %v497_v27  ;;  %v513_v5 = vmax.f32 %v511_v33, %v512_v50  ;;  %v584_v39 = vmov 1983009808  }
  0x6e   :  { %v519_v12 = vrot.slane %v518_v0, 1  ;;  %v526_v6 = vrot.slane %v525_v45, 1  ;;  %v528_v11 = vsel %vm411_vm3, %v477_v20, %v506_v60  ;;  %v538_v48 = vunpack.c.l.s4 %v584_v39 }
  0x6f   :  { %v529_v15 = vsel %vm411_vm3, %v484_v30, %v513_v5  ;;  %v541_v16 = vshrl.u32 %v540_v38, 7  ;;  %v556_v17 = vsel %vm470_vm6, %v528_v11, -inf  ;;  %vm576_vm8 = vcmask 24576  }
  0x70   :  { %v520_v18 = vmax.f32 %v518_v0, %v519_v12  ;;  %v527_v19 = vmax.f32 %v525_v45, %v526_v6  ;;  %v536_v23 = vcombine.low %v528_v11, %v529_v15  ;;  %v539_v24 = vunpack.c.0.s8 %v538_v48 }
  0x71   :  { %v557_v26 = vsel %vm470_vm6, %v529_v15, -inf }
  0x72   :  { %v530_v49 = vsel %vm411_vm3, %v491_v1, %v520_v18  ;;  %v531_v28 = vsel %vm411_vm3, %v498_v3, %v527_v19  ;;  %v542_v29 = vsub.s32 %v539_v24, %v541_v16  ;;  %v558_v54 = vmax.f32 %v556_v17, %v557_v26 }
  0x73   :  { %v544_v61 = vcombine.low %v530_v49, %v531_v28  ;;  %v559_v63 = vsel %vm470_vm6, %v530_v49, -inf  ;;  %v560_v31 = vsel %vm470_vm6, %v531_v28, -inf }
  0x74   :  { %v543_v38 = vrot.slane %v536_v23, %v542_v29  ;;  %v561_v32 = vmax.f32 %v559_v63, %v560_v31  ;;  %v562_v36 = vsel %vm470_vm6, %v558_v54, -inf }
  0x75   :  { %v551_v25 = vrot.slane %v544_v61, %v542_v29  ;;  %v563_v8 = vrot.slane %v562_v36, 4 }
  0x76   :  { %554 = vst.msk [vmem:[%s1098_s1 + $0x1] sm:$0xf] %vm185_vm1, %v543_v38  ;;  %v569_v37 = vsel %vm470_vm6, %v561_v32, -inf }
  0x77   :  { %555 = vst.msk [vmem:[%s1098_s1 + $0x19] sm:$0xf] %vm185_vm1, %v551_v25  ;;  %v564_v22 = vmax.f32 %v562_v36, %v563_v8  ;;  %v570_v40 = vrot.slane %v569_v37, 4 }
  0x79   :  { %v565_v41 = vrot.slane %v564_v22, 2  ;;  %v571_v42 = vmax.f32 %v569_v37, %v570_v40 }
  0x7b   :  { %v566_v46 = vmax.f32 %v564_v22, %v565_v41  ;;  %v572_v44 = vrot.slane %v571_v42, 2 }
  0x7d   :  { %v567_v43 = vrot.slane %v566_v46, 1  ;;  %v573_v51 = vmax.f32 %v571_v42, %v572_v44 }
  0x7f   :  { %v568_v52 = vmax.f32 %v566_v46, %v567_v43  ;;  %v574_v47 = vrot.slane %v573_v51, 1 }
  0x81   :  { %v575_v53 = vmax.f32 %v573_v51, %v574_v47  ;;  %577 = vst.msk [vmem:[%s1098_s1] sm:$0x1] %vm576_vm8, %v568_v52 }
  0x83   :  { %578 = vst.msk [vmem:[%s1098_s1 + $0x18] sm:$0x1] %vm576_vm8, %v575_v53 }

</bundles_post_ra>
